<compile_context>
chip_gen: v5e
topology: v5e:2x2
jax: 0.10.0
libtpu: 0.0.40
codegen_flags: <defaults>
</compile_context>

<pallas_src>
import functools
import math

import jax
import jax.numpy as jnp
from jax.experimental import pallas as pl
from jax.experimental.pallas import tpu as pltpu


def _decode_mlp_kernel(*refs, n_hidden_layers):
    """Fused DecodeMLP forward for one batch tile.

    refs layout:
      refs[0]                       : x tile          (TB, in_size)   bf16
      per hidden layer (4 refs)     : W_hg (Din,2H) bf16, b_hg (1,2H) f32,
                                      bn_scale (1,H) f32, bn_shift (1,H) f32
      final layer (2 refs)          : W_hg (H,2*Dout) bf16, b_hg (1,2*Dout) f32
      refs[-1]                      : out tile        (TB, out_size)  f32
    """
    x_ref = refs[0]
    out_ref = refs[-1]
    prm = refs[1:-1]

    cur = x_ref[...]                                    # bf16 activations
    idx = 0
    for _ in range(n_hidden_layers):
        w = prm[idx][...]                               # (Din, 2H) bf16
        b = prm[idx + 1][...]                           # (1, 2H)   f32
        scale = prm[idx + 2][...]                       # (1, H)    f32
        shift = prm[idx + 3][...]                       # (1, H)    f32
        idx += 4
        hg = jnp.dot(cur.astype(jnp.bfloat16), w,
                     preferred_element_type=jnp.float32) + b
        half = w.shape[1] // 2
        h = jnp.maximum(hg[:, :half], 0.0)              # relu(Linear_h(x))
        g = jax.nn.sigmoid(hg[:, half:])                # sigmoid(Linear_g(x))
        y = h * g                                       # GatedDense
        y = y * scale + shift                           # BatchNorm1d (eval, folded)
        cur = jnp.maximum(y, 0.0)                       # ReLU; Dropout(eval)=identity

    w = prm[idx][...]                                   # (H, 2*Dout) bf16
    b = prm[idx + 1][...]                               # (1, 2*Dout) f32
    hg = jnp.dot(cur.astype(jnp.bfloat16), w,
                 preferred_element_type=jnp.float32) + b
    half = w.shape[1] // 2
    h = jnp.maximum(hg[:, :half], 0.0)
    g = jax.nn.sigmoid(hg[:, half:])
    out = jnp.maximum(h * g, 0.0)                       # trailing ReLU of GatedMLP
    out_ref[...] = out.astype(out_ref.dtype)


def _pack_gated(Wh, bh, Wg, bg):
    """(Dout,Din) PyTorch Linear weights -> fused (Din, 2*Dout) bf16 slab + f32 bias."""
    W = jnp.concatenate([Wh.T, Wg.T], axis=1).astype(jnp.bfloat16)
    b = jnp.concatenate([bh, bg])[None, :].astype(jnp.float32)
    return W, b


def _pack_bn(gamma, beta, mean, var, eps=1e-5):
    scale = gamma / jnp.sqrt(var + eps)
    shift = beta - mean * scale
    return scale[None, :].astype(jnp.float32), shift[None, :].astype(jnp.float32)


def decode_mlp_forward(x, params, out_size, *, batch_tile=256):
    """x: (N, *input_size); params: {'hidden': [(Wh,bh,Wg,bg,gamma,beta,mean,var),...],
                                      'final' : (Wh,bh,Wg,bg)}  (PyTorch layouts)."""
    N = x.shape[0]
    x2 = x.reshape(N, -1).astype(jnp.bfloat16)          # flatten + halve input DMA
    in_size = x2.shape[1]

    # ---- batch tiling (grid pipelining + megacore) ---------------------------
    TB = batch_tile if N >= batch_tile else N
    N_pad = -(-N // TB) * TB
    if N_pad != N:
        x2 = jnp.pad(x2, ((0, N_pad - N), (0, 0)))
    nb = N_pad // TB

    # ---- pack parameters into dense, fused 2D slabs --------------------------
    flat_inputs = [x2]
    in_specs = [pl.BlockSpec((TB, in_size), lambda i: (i, 0))]

    def _rep_spec(a):
        nd = a.ndim
        return pl.BlockSpec(a.shape, lambda i: (0,) * nd)

    n_hidden_layers = len(params["hidden"])
    for (Wh, bh, Wg, bg, gamma, beta, mean, var) in params["hidden"]:
        W, b = _pack_gated(Wh, bh, Wg, bg)
        scale, shift = _pack_bn(gamma, beta, mean, var)
        for a in (W, b, scale, shift):
            flat_inputs.append(a)
            in_specs.append(_rep_spec(a))

    Wh, bh, Wg, bg = params["final"]
    Wf, bf = _pack_gated(Wh, bh, Wg, bg)
    for a in (Wf, bf):
        flat_inputs.append(a)
        in_specs.append(_rep_spec(a))

    out_dim = Wf.shape[1] // 2

    kernel = functools.partial(_decode_mlp_kernel,
                               n_hidden_layers=n_hidden_layers)

    out = pl.pallas_call(
        kernel,
        out_shape=jax.ShapeDtypeStruct((N_pad, out_dim), jnp.float32),
        grid_spec=pltpu.PrefetchScalarGridSpec(
            num_scalar_prefetch=0,
            grid=(nb,),
            in_specs=in_specs,
            out_specs=pl.BlockSpec((TB, out_dim), lambda i: (i, 0)),
        ),
        compiler_params=pltpu.CompilerParams(
            dimension_semantics=("parallel",),
            vmem_limit_bytes=32 * 1024 * 1024),
    )(*flat_inputs)

    out = out[:N]
    if len(out_size) > 1:
        out = out.reshape((N,) + tuple(out_size))
    return out


def _reference(x, params, out_size):
    """Pure-JAX fp32 reference with the same (eval-mode) math as the PyTorch module."""
    N = x.shape[0]
    cur = x.reshape(N, -1).astype(jnp.float32)
    for (Wh, bh, Wg, bg, gamma, beta, mean, var) in params["hidden"]:
        h = jnp.maximum(cur @ Wh.T + bh, 0.0)
        g = jax.nn.sigmoid(cur @ Wg.T + bg)
        y = h * g
        y = (y - mean) / jnp.sqrt(var + 1e-5) * gamma + beta
        cur = jnp.maximum(y, 0.0)
    Wh, bh, Wg, bg = params["final"]
    h = jnp.maximum(cur @ Wh.T + bh, 0.0)
    g = jax.nn.sigmoid(cur @ Wg.T + bg)
    out = jnp.maximum(h * g, 0.0)
    if len(out_size) > 1:
        out = out.reshape((N,) + tuple(out_size))
    return out


if __name__ == "__main__":
    # DecodeMLP config: input_size=(4,16,16) -> 1024, n_hidden=128, n_layers=3,
    # output_size=(4,16,16) -> 1024, type_mod='gated_mlp'.
    N, C, Hs, Ws = 2, 4, 16, 16
    in_size = C * Hs * Ws
    hidden = 128
    out_size = (C, Hs, Ws)
    out_flat = C * Hs * Ws
    n_layers = 3

    key = jax.random.PRNGKey(0)
    keys = iter(jax.random.split(key, 32))

    x = jax.random.normal(next(keys), (N, C, Hs, Ws), jnp.float32)

    def linear_params(k, din, dout, scale):
        k1, k2 = jax.random.split(k)
        W = scale * jax.random.normal(k1, (dout, din), jnp.float32)
        b = 0.1 * jax.random.normal(k2, (dout,), jnp.float32)
        return W, b

    hidden_layers = []
    d_in = in_size
    for _ in range(n_layers - 1):
        s = 1.0 / math.sqrt(d_in)
        Wh, bh = linear_params(next(keys), d_in, hidden, s)
        Wg, bg = linear_params(next(keys), d_in, hidden, s)
        gamma = 1.0 + 0.1 * jax.random.normal(next(keys), (hidden,), jnp.float32)
        beta = 0.1 * jax.random.normal(next(keys), (hidden,), jnp.float32)
        mean = 0.1 * jax.random.normal(next(keys), (hidden,), jnp.float32)
        var = jax.random.uniform(next(keys), (hidden,), jnp.float32, 0.5, 1.5)
        hidden_layers.append((Wh, bh, Wg, bg, gamma, beta, mean, var))
        d_in = hidden

    s = 1.0 / math.sqrt(d_in)
    Wh, bh = linear_params(next(keys), d_in, out_flat, s)
    Wg, bg = linear_params(next(keys), d_in, out_flat, s)
    params = {"hidden": hidden_layers, "final": (Wh, bh, Wg, bg)}

    out = decode_mlp_forward(x, params, out_size)
    out = jax.block_until_ready(out)

    ref = _reference(x, params, out_size)
    assert out.shape == ref.shape == (N, C, Hs, Ws), (out.shape, ref.shape)
    # bf16 MXU operands vs fp32 reference -> loose-ish tolerance.
    assert jnp.allclose(out, ref, rtol=5e-2, atol=5e-2), \
        float(jnp.max(jnp.abs(out - ref)))

    print("KERNEL_OK")
</pallas_src>

<mosaic_0001>
module attributes {stable_mosaic.version = 11 : i64} {
  func.func @_decode_mlp_kernel(%arg0: i32, %arg1: memref<2x1024xbf16, #tpu.memory_space<vmem>>, %arg2: memref<1024x256xbf16, #tpu.memory_space<vmem>>, %arg3: memref<1x256xf32, #tpu.memory_space<vmem>>, %arg4: memref<1x128xf32, #tpu.memory_space<vmem>>, %arg5: memref<1x128xf32, #tpu.memory_space<vmem>>, %arg6: memref<128x256xbf16, #tpu.memory_space<vmem>>, %arg7: memref<1x256xf32, #tpu.memory_space<vmem>>, %arg8: memref<1x128xf32, #tpu.memory_space<vmem>>, %arg9: memref<1x128xf32, #tpu.memory_space<vmem>>, %arg10: memref<128x2048xbf16, #tpu.memory_space<vmem>>, %arg11: memref<1x2048xf32, #tpu.memory_space<vmem>>, %arg12: memref<2x1024xf32, #tpu.memory_space<vmem>>) attributes {dimension_semantics = [#tpu.dimension_semantics<parallel>], iteration_bounds = array<i64: 1>, scalar_prefetch = 0 : i64, scratch_operands = 0 : i64, tpu.core_type = #tpu.core_type<tc>, window_params = [{transform_indices = @transform_0, window_bounds = array<i64: 2, 1024>}, {pipeline_mode = #tpu.pipeline_mode<synchronous>, transform_indices = @transform_1, window_bounds = array<i64: 1024, 256>}, {pipeline_mode = #tpu.pipeline_mode<synchronous>, transform_indices = @transform_2, window_bounds = array<i64: 1, 256>}, {pipeline_mode = #tpu.pipeline_mode<synchronous>, transform_indices = @transform_3, window_bounds = array<i64: 1, 128>}, {pipeline_mode = #tpu.pipeline_mode<synchronous>, transform_indices = @transform_4, window_bounds = array<i64: 1, 128>}, {pipeline_mode = #tpu.pipeline_mode<synchronous>, transform_indices = @transform_5, window_bounds = array<i64: 128, 256>}, {pipeline_mode = #tpu.pipeline_mode<synchronous>, transform_indices = @transform_6, window_bounds = array<i64: 1, 256>}, {pipeline_mode = #tpu.pipeline_mode<synchronous>, transform_indices = @transform_7, window_bounds = array<i64: 1, 128>}, {pipeline_mode = #tpu.pipeline_mode<synchronous>, transform_indices = @transform_8, window_bounds = array<i64: 1, 128>}, {pipeline_mode = #tpu.pipeline_mode<synchronous>, transform_indices = @transform_9, window_bounds = array<i64: 128, 2048>}, {pipeline_mode = #tpu.pipeline_mode<synchronous>, transform_indices = @transform_10, window_bounds = array<i64: 1, 2048>}, {transform_indices = @transform_11, window_bounds = array<i64: 2, 1024>}]} {
    %c0 = arith.constant 0 : index
    %c0_0 = arith.constant 0 : index
    %0 = vector.load %arg1[%c0, %c0_0] : memref<2x1024xbf16, #tpu.memory_space<vmem>>, vector<2x1024xbf16>
    %c0_1 = arith.constant 0 : index
    %c0_2 = arith.constant 0 : index
    %1 = vector.load %arg2[%c0_1, %c0_2] : memref<1024x256xbf16, #tpu.memory_space<vmem>>, vector<1024x256xbf16>
    %c0_3 = arith.constant 0 : index
    %c0_4 = arith.constant 0 : index
    %2 = vector.load %arg3[%c0_3, %c0_4] : memref<1x256xf32, #tpu.memory_space<vmem>>, vector<1x256xf32>
    %c0_5 = arith.constant 0 : index
    %c0_6 = arith.constant 0 : index
    %3 = vector.load %arg4[%c0_5, %c0_6] : memref<1x128xf32, #tpu.memory_space<vmem>>, vector<1x128xf32>
    %c0_7 = arith.constant 0 : index
    %c0_8 = arith.constant 0 : index
    %4 = vector.load %arg5[%c0_7, %c0_8] : memref<1x128xf32, #tpu.memory_space<vmem>>, vector<1x128xf32>
    %cst = arith.constant dense<0.000000e+00> : vector<2x256xf32>
    %5 = tpu.matmul %0, %1, %cst {dimension_numbers = #tpu.dot_dimension_numbers<[1], [0], [0], [1], [0, 0, 1, 1], [], []>} : vector<2x1024xbf16>, vector<1024x256xbf16>, vector<2x256xf32> -> vector<2x256xf32>
    %6 = vector.broadcast %2 : vector<1x256xf32> to vector<2x256xf32>
    %7 = arith.addf %5, %6 : vector<2x256xf32>
    %8 = vector.extract_strided_slice %7 {offsets = [0, 0], sizes = [2, 128], strides = [1, 1]} : vector<2x256xf32> to vector<2x128xf32>
    %cst_9 = arith.constant 0.000000e+00 : f32
    %9 = vector.broadcast %cst_9 : f32 to vector<2x128xf32>
    %10 = arith.maximumf %8, %9 : vector<2x128xf32>
    %11 = vector.extract_strided_slice %7 {offsets = [0, 128], sizes = [2, 128], strides = [1, 1]} : vector<2x256xf32> to vector<2x128xf32>
    %12 = arith.negf %11 : vector<2x128xf32>
    %13 = math.exp %12 : vector<2x128xf32>
    %cst_10 = arith.constant 1.000000e+00 : f32
    %14 = vector.broadcast %cst_10 : f32 to vector<2x128xf32>
    %15 = arith.addf %14, %13 : vector<2x128xf32>
    %16 = arith.divf %14, %15 : vector<2x128xf32>
    %17 = arith.mulf %10, %16 : vector<2x128xf32>
    %18 = vector.broadcast %3 : vector<1x128xf32> to vector<2x128xf32>
    %19 = arith.mulf %17, %18 : vector<2x128xf32>
    %20 = vector.broadcast %4 : vector<1x128xf32> to vector<2x128xf32>
    %21 = arith.addf %19, %20 : vector<2x128xf32>
    %cst_11 = arith.constant 0.000000e+00 : f32
    %22 = vector.broadcast %cst_11 : f32 to vector<2x128xf32>
    %23 = arith.maximumf %21, %22 : vector<2x128xf32>
    %c0_12 = arith.constant 0 : index
    %c0_13 = arith.constant 0 : index
    %24 = vector.load %arg6[%c0_12, %c0_13] : memref<128x256xbf16, #tpu.memory_space<vmem>>, vector<128x256xbf16>
    %c0_14 = arith.constant 0 : index
    %c0_15 = arith.constant 0 : index
    %25 = vector.load %arg7[%c0_14, %c0_15] : memref<1x256xf32, #tpu.memory_space<vmem>>, vector<1x256xf32>
    %c0_16 = arith.constant 0 : index
    %c0_17 = arith.constant 0 : index
    %26 = vector.load %arg8[%c0_16, %c0_17] : memref<1x128xf32, #tpu.memory_space<vmem>>, vector<1x128xf32>
    %c0_18 = arith.constant 0 : index
    %c0_19 = arith.constant 0 : index
    %27 = vector.load %arg9[%c0_18, %c0_19] : memref<1x128xf32, #tpu.memory_space<vmem>>, vector<1x128xf32>
    %28 = arith.truncf %23 : vector<2x128xf32> to vector<2x128xbf16>
    %cst_20 = arith.constant dense<0.000000e+00> : vector<2x256xf32>
    %29 = tpu.matmul %28, %24, %cst_20 {dimension_numbers = #tpu.dot_dimension_numbers<[1], [0], [0], [1], [0, 0, 1, 1], [], []>} : vector<2x128xbf16>, vector<128x256xbf16>, vector<2x256xf32> -> vector<2x256xf32>
    %30 = vector.broadcast %25 : vector<1x256xf32> to vector<2x256xf32>
    %31 = arith.addf %29, %30 : vector<2x256xf32>
    %32 = vector.extract_strided_slice %31 {offsets = [0, 0], sizes = [2, 128], strides = [1, 1]} : vector<2x256xf32> to vector<2x128xf32>
    %cst_21 = arith.constant 0.000000e+00 : f32
    %33 = vector.broadcast %cst_21 : f32 to vector<2x128xf32>
    %34 = arith.maximumf %32, %33 : vector<2x128xf32>
    %35 = vector.extract_strided_slice %31 {offsets = [0, 128], sizes = [2, 128], strides = [1, 1]} : vector<2x256xf32> to vector<2x128xf32>
    %36 = arith.negf %35 : vector<2x128xf32>
    %37 = math.exp %36 : vector<2x128xf32>
    %cst_22 = arith.constant 1.000000e+00 : f32
    %38 = vector.broadcast %cst_22 : f32 to vector<2x128xf32>
    %39 = arith.addf %38, %37 : vector<2x128xf32>
    %40 = arith.divf %38, %39 : vector<2x128xf32>
    %41 = arith.mulf %34, %40 : vector<2x128xf32>
    %42 = vector.broadcast %26 : vector<1x128xf32> to vector<2x128xf32>
    %43 = arith.mulf %41, %42 : vector<2x128xf32>
    %44 = vector.broadcast %27 : vector<1x128xf32> to vector<2x128xf32>
    %45 = arith.addf %43, %44 : vector<2x128xf32>
    %cst_23 = arith.constant 0.000000e+00 : f32
    %46 = vector.broadcast %cst_23 : f32 to vector<2x128xf32>
    %47 = arith.maximumf %45, %46 : vector<2x128xf32>
    %c0_24 = arith.constant 0 : index
    %c0_25 = arith.constant 0 : index
    %48 = vector.load %arg10[%c0_24, %c0_25] : memref<128x2048xbf16, #tpu.memory_space<vmem>>, vector<128x2048xbf16>
    %c0_26 = arith.constant 0 : index
    %c0_27 = arith.constant 0 : index
    %49 = vector.load %arg11[%c0_26, %c0_27] : memref<1x2048xf32, #tpu.memory_space<vmem>>, vector<1x2048xf32>
    %50 = arith.truncf %47 : vector<2x128xf32> to vector<2x128xbf16>
    %cst_28 = arith.constant dense<0.000000e+00> : vector<2x2048xf32>
    %51 = tpu.matmul %50, %48, %cst_28 {dimension_numbers = #tpu.dot_dimension_numbers<[1], [0], [0], [1], [0, 0, 1, 1], [], []>} : vector<2x128xbf16>, vector<128x2048xbf16>, vector<2x2048xf32> -> vector<2x2048xf32>
    %52 = vector.broadcast %49 : vector<1x2048xf32> to vector<2x2048xf32>
    %53 = arith.addf %51, %52 : vector<2x2048xf32>
    %54 = vector.extract_strided_slice %53 {offsets = [0, 0], sizes = [2, 1024], strides = [1, 1]} : vector<2x2048xf32> to vector<2x1024xf32>
    %cst_29 = arith.constant 0.000000e+00 : f32
    %55 = vector.broadcast %cst_29 : f32 to vector<2x1024xf32>
    %56 = arith.maximumf %54, %55 : vector<2x1024xf32>
    %57 = vector.extract_strided_slice %53 {offsets = [0, 1024], sizes = [2, 1024], strides = [1, 1]} : vector<2x2048xf32> to vector<2x1024xf32>
    %58 = arith.negf %57 : vector<2x1024xf32>
    %59 = math.exp %58 : vector<2x1024xf32>
    %cst_30 = arith.constant 1.000000e+00 : f32
    %60 = vector.broadcast %cst_30 : f32 to vector<2x1024xf32>
    %61 = arith.addf %60, %59 : vector<2x1024xf32>
    %62 = arith.divf %60, %61 : vector<2x1024xf32>
    %63 = arith.mulf %56, %62 : vector<2x1024xf32>
    %cst_31 = arith.constant 0.000000e+00 : f32
    %64 = vector.broadcast %cst_31 : f32 to vector<2x1024xf32>
    %65 = arith.maximumf %63, %64 : vector<2x1024xf32>
    %c0_32 = arith.constant 0 : index
    %c0_33 = arith.constant 0 : index
    %66 = vector.load %arg12[%c0_32, %c0_33] : memref<2x1024xf32, #tpu.memory_space<vmem>>, vector<2x1024xf32>
    tpu.vector_store %arg12[%c0_32, %c0_33], %65 {strides = array<i32>} : memref<2x1024xf32, #tpu.memory_space<vmem>>, vector<2x1024xf32>,
    return
  }
  func.func @transform_0(%arg0: i32) -> (i32, i32) {
    %c0_i32 = arith.constant 0 : i32
    %c0_i32_0 = arith.constant 0 : i32
    return %arg0, %c0_i32 : i32, i32
  }
  func.func @transform_1(%arg0: i32) -> (i32, i32) {
    %c0_i32 = arith.constant 0 : i32
    %c0_i32_0 = arith.constant 0 : i32
    %c0_i32_1 = arith.constant 0 : i32
    return %c0_i32, %c0_i32_0 : i32, i32
  }
  func.func @transform_2(%arg0: i32) -> (i32, i32) {
    %c0_i32 = arith.constant 0 : i32
    %c0_i32_0 = arith.constant 0 : i32
    %c0_i32_1 = arith.constant 0 : i32
    return %c0_i32, %c0_i32_0 : i32, i32
  }
  func.func @transform_3(%arg0: i32) -> (i32, i32) {
    %c0_i32 = arith.constant 0 : i32
    %c0_i32_0 = arith.constant 0 : i32
    %c0_i32_1 = arith.constant 0 : i32
    return %c0_i32, %c0_i32_0 : i32, i32
  }
  func.func @transform_4(%arg0: i32) -> (i32, i32) {
    %c0_i32 = arith.constant 0 : i32
    %c0_i32_0 = arith.constant 0 : i32
    %c0_i32_1 = arith.constant 0 : i32
    return %c0_i32, %c0_i32_0 : i32, i32
  }
  func.func @transform_5(%arg0: i32) -> (i32, i32) {
    %c0_i32 = arith.constant 0 : i32
    %c0_i32_0 = arith.constant 0 : i32
    %c0_i32_1 = arith.constant 0 : i32
    return %c0_i32, %c0_i32_0 : i32, i32
  }
  func.func @transform_6(%arg0: i32) -> (i32, i32) {
    %c0_i32 = arith.constant 0 : i32
    %c0_i32_0 = arith.constant 0 : i32
    %c0_i32_1 = arith.constant 0 : i32
    return %c0_i32, %c0_i32_0 : i32, i32
  }
  func.func @transform_7(%arg0: i32) -> (i32, i32) {
    %c0_i32 = arith.constant 0 : i32
    %c0_i32_0 = arith.constant 0 : i32
    %c0_i32_1 = arith.constant 0 : i32
    return %c0_i32, %c0_i32_0 : i32, i32
  }
  func.func @transform_8(%arg0: i32) -> (i32, i32) {
    %c0_i32 = arith.constant 0 : i32
    %c0_i32_0 = arith.constant 0 : i32
    %c0_i32_1 = arith.constant 0 : i32
    return %c0_i32, %c0_i32_0 : i32, i32
  }
  func.func @transform_9(%arg0: i32) -> (i32, i32) {
    %c0_i32 = arith.constant 0 : i32
    %c0_i32_0 = arith.constant 0 : i32
    %c0_i32_1 = arith.constant 0 : i32
    return %c0_i32, %c0_i32_0 : i32, i32
  }
  func.func @transform_10(%arg0: i32) -> (i32, i32) {
    %c0_i32 = arith.constant 0 : i32
    %c0_i32_0 = arith.constant 0 : i32
    %c0_i32_1 = arith.constant 0 : i32
    return %c0_i32, %c0_i32_0 : i32, i32
  }
  func.func @transform_11(%arg0: i32) -> (i32, i32) {
    %c0_i32 = arith.constant 0 : i32
    %c0_i32_0 = arith.constant 0 : i32
    return %arg0, %c0_i32 : i32, i32
  }
}

</mosaic_0001>

<bundles_post_ra>
// kernel: tpu_custom_call.1
= control target key start
LH: loop header
LB: loop body
LE: loop exit
PB: predicated region body
PF: predicated region fallthrough
CT: control target
= control target key end

     0   :  { %16 = vsyncpa [#allocation3], 0  ;;  %s4521_s0 = inlined_call_operand.hbm [shape: bf16[2,1024], index: 0, kind: input, shape index: {}]   ;;  %s4522_s1 = inlined_call_operand.hbm [shape: bf16[1024,256], index: 1, kind: input, shape index: {}]   ;;  %s4523_s2 = inlined_call_operand.hbm [shape: f32[1,256], index: 2, kind: input, shape index: {}]   ;;  %s4524_s3 = inlined_call_operand.vmem [shape: f32[1,128], index: 3, kind: input, shape index: {}]   ;;  %s4525_s4 = inlined_call_operand.hbm [shape: f32[1,128], index: 4, kind: input, shape index: {}]   ;;  %s4526_s5 = inlined_call_operand.hbm [shape: bf16[128,256], index: 5, kind: input, shape index: {}]   ;;  %s4527_s6 = inlined_call_operand.vmem [shape: f32[1,256], index: 6, kind: input, shape index: {}]   ;;  %s4528_s7 = inlined_call_operand.vmem [shape: f32[1,128], index: 7, kind: input, shape index: {}]   ;;  %s4529_s8 = inlined_call_operand.vmem [shape: f32[1,128], index: 8, kind: input, shape index: {}]   ;;  %s4530_s9 = inlined_call_operand.hbm [shape: bf16[128,2048], index: 9, kind: input, shape index: {}]   ;;  %s4531_s10 = inlined_call_operand.hbm [shape: f32[1,2048], index: 10, kind: input, shape index: {}]   ;;  %s4532_s11 = inlined_call_operand.hbm [shape: f32[2,1024], index: 11, kind: output, shape index: {}]  }
   0x1   :  { %17 = vsyncpa [#allocation6], 0 }
   0x2   :  { %18 = vsyncpa [#allocation9], 0 }
   0x3   :  { %19 = vsyncpa [#allocation12], 0  ;;  %s36_s19 = sshll.u32 %s4522_s1, 4  ;;  %s37_s19 = int_to_ptr.hbm [resolvable:$true] %s36_s19 }
   0x4   :  { %20 = vsyncpa [#allocation4], 0  ;;  %s4198_s20 = smov [#allocation5]   ;;  %s63_s24 = sshll.u32 %s4525_s4, 4  ;;  %s64_s24 = int_to_ptr.hbm [resolvable:$true] %s63_s24 }
   0x5   :  { %s38_s21 = sshll.u32 %s4198_s20, 4  ;;  %s4199_s25 = smov 128   ;;  %s39_s21 = int_to_ptr.vmem [resolvable:$true] %s38_s21 }
   0x6   :  { %s4200_s26 = smov 8   ;;  %s4201_s27 = smov [#allocation8]  }
   0x7   :  { %44 = dma.hbm_to_vmem [thread:$0]  %s37_s19, 16384, %s39_s21, [#allocation6], %s4199_s25, %s4199_s25, %s4200_s26  }
   0x8   :  { %s65_s28 = sshll.u32 %s4201_s27, 4  ;;  %s92_s30 = sshll.u32 %s4530_s9, 4  ;;  %s66_s28 = int_to_ptr.vmem [resolvable:$true] %s65_s28  ;;  %s93_s30 = int_to_ptr.hbm [resolvable:$true] %s92_s30 }
   0x9   :  { %68 = dma.hbm_to_vmem [thread:$0]  %s64_s24, 16, %s66_s28, [#allocation9]  }
   0xa   :  { %s4202_s12 = smov [#allocation11]   ;;  %s26_s15 = sshll.u32 %s4521_s0, 4  ;;  %s27_s15 = int_to_ptr.hbm [resolvable:$true] %s26_s15 }
   0xb   :  { %s94_s13 = sshll.u32 %s4202_s12, 4  ;;  %s4203_s16 = smov 1024   ;;  %s95_s13 = int_to_ptr.vmem [resolvable:$true] %s94_s13 }
   0xc   :  { %s4204_s17 = smov 64   ;;  %s4205_s18 = smov [#allocation2]  }
   0xd   :  { %100 = dma.hbm_to_vmem [thread:$0]  %s93_s30, 16384, %s95_s13, [#allocation12], %s4203_s16, %s4203_s16, %s4204_s17  }
   0xe   :  { %s28_s19 = sshll.u32 %s4205_s18, 4  ;;  %s50_s9 = sshll.u32 %s4523_s2, 4  ;;  %s29_s19 = int_to_ptr.vmem [resolvable:$true] %s28_s19  ;;  %s51_s9 = int_to_ptr.hbm [resolvable:$true] %s50_s9 }
   0xf   :  { %31 = dma.hbm_to_vmem [thread:$0]  %s27_s15, 128, %s29_s19, [#allocation3]  }
  0x10   :  { %s73_s24 = sshll.u32 %s4526_s5, 4  ;;  %s4206_s27 = smov [#allocation7]   ;;  %s74_s24 = int_to_ptr.hbm [resolvable:$true] %s73_s24 }
  0x11   :  { %s52_s28 = sshll.u32 %s4206_s27, 4  ;;  %s4207_s0 = smov [#allocation10]   ;;  %s53_s28 = int_to_ptr.vmem [resolvable:$true] %s52_s28 }
  0x12   :  { %55 = dma.hbm_to_vmem [thread:$0]  %s51_s9, 32, %s53_s28, [#allocation6]  }
  0x13   :  { %s75_s29 = sshll.u32 %s4207_s0, 4  ;;  %s106_s12 = sshll.u32 %s4531_s10, 4  ;;  %s76_s29 = int_to_ptr.vmem [resolvable:$true] %s75_s29  ;;  %s107_s12 = int_to_ptr.hbm [resolvable:$true] %s106_s12 }
  0x14   :  { %81 = dma.hbm_to_vmem [thread:$0]  %s74_s24, 2048, %s76_s29, [#allocation9], %s4199_s25, %s4199_s25, %s4200_s26  }
  0x15   :  { %s4208_s2 = smov [#allocation13]  }
  0x16   :  { %s108_s13 = sshll.u32 %s4208_s2, 4  ;;  %s109_s13 = int_to_ptr.vmem [resolvable:$true] %s108_s13 }
  0x17   :  { %111 = dma.hbm_to_vmem [thread:$0]  %s107_s12, 256, %s109_s13, [#allocation12]  }
  0x18   :  { %4188 = dma.done.wait [#allocation3], 128  }
  0x19   :  { %4189 = vsyncadd [#allocation3], 4294967168 }
  0x1a   :  { %4190 = dma.done.wait [#allocation6], 16416  }
  0x1b   :  { %4191 = vsyncadd [#allocation6], 4294950880 }
  0x1c   :  { %4192 = dma.done.wait [#allocation9], 2064  }
  0x1d   :  { %4193 = vsyncadd [#allocation9], 4294965232 }
  0x1e   :  { %4194 = dma.done.wait [#allocation12], 16640  }
  0x1f   :  { %4195 = vsyncadd [#allocation12], 4294950656  ;;  %v2628_v0 = vld [vmem:[#allocation5 + $0x70] sm:$0xf]  ;;  %v3683_v1 = vld [vmem:[#allocation5 + $0x74] sm:$0xf0] }
  0x20   :  { %v2692_v2 = vld [vmem:[#allocation5 + $0xf0] sm:$0xf]  ;;  %v2629_v3 = vor.u32 %v3683_v1, %v2628_v0  ;;  %v3699_v4 = vld [vmem:[#allocation5 + $0xf4] sm:$0xf0]  ;;  %v2620_v11 = vld [vmem:[#allocation5 + $0x60] sm:$0xf] }
  0x21   :  { %v2756_v5 = vld [vmem:[#allocation5 + $0x170] sm:$0xf]  ;;  %v3715_v6 = vld [vmem:[#allocation5 + $0x174] sm:$0xf0]  ;;  %v2693_v7 = vor.u32 %v3699_v4, %v2692_v2  ;;  %v3681_v13 = vld [vmem:[#allocation5 + $0x64] sm:$0xf0] }
  0x22   :  { %v2757_v8 = vor.u32 %v3715_v6, %v2756_v5  ;;  %v2820_v9 = vld [vmem:[#allocation5 + $0x1f0] sm:$0xf]  ;;  %v3731_v10 = vld [vmem:[#allocation5 + $0x1f4] sm:$0xf0]  ;;  %935 = vmatpush.bf16.msra.mxu0 %v2629_v3  ;;  %v2684_v14 = vld [vmem:[#allocation5 + $0xe0] sm:$0xf]  ;;  %v2621_v16 = vor.u32 %v3681_v13, %v2620_v11 }
  0x23   :  { %v2821_v12 = vor.u32 %v3731_v10, %v2820_v9  ;;  %v3697_v15 = vld [vmem:[#allocation5 + $0xe4] sm:$0xf0]  ;;  %948 = vmatpush.bf16.msra.mxu1 %v2693_v7  ;;  %v2748_v18 = vld [vmem:[#allocation5 + $0x160] sm:$0xf]  ;;  %v2612_v23 = vld [vmem:[#allocation5 + $0x50] sm:$0xf] }
  0x24   :  { %961 = vmatpush.bf16.msra.mxu2 %v2757_v8  ;;  %v2685_v17 = vor.u32 %v3697_v15, %v2684_v14  ;;  %v3713_v19 = vld [vmem:[#allocation5 + $0x164] sm:$0xf0]  ;;  %v2812_v20 = vld [vmem:[#allocation5 + $0x1e0] sm:$0xf]  ;;  %v3679_v24 = vld [vmem:[#allocation5 + $0x54] sm:$0xf0] }
  0x25   :  { %974 = vmatpush.bf16.msra.mxu3 %v2821_v12  ;;  %v2749_v21 = vor.u32 %v3713_v19, %v2748_v18  ;;  %v3729_v22 = vld [vmem:[#allocation5 + $0x1e4] sm:$0xf0]  ;;  %v2676_v26 = vld [vmem:[#allocation5 + $0xd0] sm:$0xf]  ;;  %v3695_v27 = vld [vmem:[#allocation5 + $0xd4] sm:$0xf0]  ;;  %v2613_v29 = vor.u32 %v3679_v24, %v2612_v23 }
  0x26   :  { %v2813_v25 = vor.u32 %v3729_v22, %v2812_v20  ;;  %v2740_v28 = vld [vmem:[#allocation5 + $0x150] sm:$0xf]  ;;  %936 = vmatpush.bf16.msra.mxu0 %v2621_v16  ;;  %v3711_v30 = vld [vmem:[#allocation5 + $0x154] sm:$0xf0]  ;;  %v2677_v33 = vor.u32 %v3695_v27, %v2676_v26  ;;  %v2604_v35 = vld [vmem:[#allocation5 + $0x40] sm:$0xf] }
  0x27   :  { %v2804_v31 = vld [vmem:[#allocation5 + $0x1d0] sm:$0xf]  ;;  %v3727_v32 = vld [vmem:[#allocation5 + $0x1d4] sm:$0xf0]  ;;  %949 = vmatpush.bf16.msra.mxu1 %v2685_v17  ;;  %v2741_v34 = vor.u32 %v3711_v30, %v2740_v28  ;;  %v3677_v36 = vld [vmem:[#allocation5 + $0x44] sm:$0xf0] }
  0x28   :  { %962 = vmatpush.bf16.msra.mxu2 %v2749_v21  ;;  %v2668_v37 = vld [vmem:[#allocation5 + $0xc0] sm:$0xf]  ;;  %v2805_v38 = vor.u32 %v3727_v32, %v2804_v31  ;;  %v3693_v39 = vld [vmem:[#allocation5 + $0xc4] sm:$0xf0]  ;;  %v2605_v44 = vor.u32 %v3677_v36, %v2604_v35  ;;  %v2596_v47 = vld [vmem:[#allocation5 + $0x30] sm:$0xf] }
  0x29   :  { %975 = vmatpush.bf16.msra.mxu3 %v2813_v25  ;;  %v2732_v40 = vld [vmem:[#allocation5 + $0x140] sm:$0xf]  ;;  %v3709_v41 = vld [vmem:[#allocation5 + $0x144] sm:$0xf0]  ;;  %v2669_v45 = vor.u32 %v3693_v39, %v2668_v37  ;;  %v3675_v48 = vld [vmem:[#allocation5 + $0x34] sm:$0xf0] }
  0x2a   :  { %v2796_v42 = vld [vmem:[#allocation5 + $0x1c0] sm:$0xf]  ;;  %v3725_v43 = vld [vmem:[#allocation5 + $0x1c4] sm:$0xf0]  ;;  %937 = vmatpush.bf16.msra.mxu0 %v2613_v29  ;;  %v2733_v46 = vor.u32 %v3709_v41, %v2732_v40  ;;  %v2660_v49 = vld [vmem:[#allocation5 + $0xb0] sm:$0xf]  ;;  %v2597_v56 = vor.u32 %v3675_v48, %v2596_v47 }
  0x2b   :  { %950 = vmatpush.bf16.msra.mxu1 %v2677_v33  ;;  %v2797_v50 = vor.u32 %v3725_v43, %v2796_v42  ;;  %v3691_v51 = vld [vmem:[#allocation5 + $0xb4] sm:$0xf0]  ;;  %v2724_v52 = vld [vmem:[#allocation5 + $0x130] sm:$0xf]  ;;  %v2588_v59 = vld [vmem:[#allocation5 + $0x20] sm:$0xf] }
  0x2c   :  { %963 = vmatpush.bf16.msra.mxu2 %v2741_v34  ;;  %v3707_v53 = vld [vmem:[#allocation5 + $0x134] sm:$0xf0]  ;;  %v2788_v54 = vld [vmem:[#allocation5 + $0x1b0] sm:$0xf]  ;;  %v2661_v57 = vor.u32 %v3691_v51, %v2660_v49  ;;  %v3673_v60 = vld [vmem:[#allocation5 + $0x24] sm:$0xf0] }
  0x2d   :  { %976 = vmatpush.bf16.msra.mxu3 %v2805_v38  ;;  %v3723_v55 = vld [vmem:[#allocation5 + $0x1b4] sm:$0xf0]  ;;  %v2725_v58 = vor.u32 %v3707_v53, %v2724_v52  ;;  %v2652_v61 = vld [vmem:[#allocation5 + $0xa0] sm:$0xf]  ;;  %v3689_v63 = vld [vmem:[#allocation5 + $0xa4] sm:$0xf0]  ;;  %v2589_v4 = vor.u32 %v3673_v60, %v2588_v59 }
  0x2e   :  { %938 = vmatpush.bf16.msra.mxu0 %v2605_v44  ;;  %v2789_v62 = vor.u32 %v3723_v55, %v2788_v54  ;;  %v2716_v0 = vld [vmem:[#allocation5 + $0x120] sm:$0xf]  ;;  %v3705_v1 = vld [vmem:[#allocation5 + $0x124] sm:$0xf0]  ;;  %v2653_v5 = vor.u32 %v3689_v63, %v2652_v61  ;;  %v2580_v7 = vld [vmem:[#allocation5 + $0x10] sm:$0xf] }
  0x2f   :  { %951 = vmatpush.bf16.msra.mxu1 %v2669_v45  ;;  %v2780_v2 = vld [vmem:[#allocation5 + $0x1a0] sm:$0xf]  ;;  %v3721_v3 = vld [vmem:[#allocation5 + $0x1a4] sm:$0xf0]  ;;  %v2717_v6 = vor.u32 %v3705_v1, %v2716_v0  ;;  %v3671_v8 = vld [vmem:[#allocation5 + $0x14] sm:$0xf0] }
  0x30   :  { %964 = vmatpush.bf16.msra.mxu2 %v2733_v46  ;;  %v2644_v9 = vld [vmem:[#allocation5 + $0x90] sm:$0xf]  ;;  %v2781_v10 = vor.u32 %v3721_v3, %v2780_v2  ;;  %v3687_v11 = vld [vmem:[#allocation5 + $0x94] sm:$0xf0]  ;;  %v2581_v16 = vor.u32 %v3671_v8, %v2580_v7  ;;  %v2572_v17 = vld [vmem:[#allocation5] sm:$0xf] }
  0x31   :  { %977 = vmatpush.bf16.msra.mxu3 %v2797_v50  ;;  %v2708_v12 = vld [vmem:[#allocation5 + $0x110] sm:$0xf]  ;;  %v3703_v13 = vld [vmem:[#allocation5 + $0x114] sm:$0xf0]  ;;  %v3669_v18 = vld [vmem:[#allocation5 + $0x4] sm:$0xf0]  ;;  %v2645_v19 = vor.u32 %v3687_v11, %v2644_v9 }
  0x32   :  { %939 = vmatpush.bf16.msra.mxu0 %v2597_v56  ;;  %v2772_v14 = vld [vmem:[#allocation5 + $0x190] sm:$0xf]  ;;  %v3719_v15 = vld [vmem:[#allocation5 + $0x194] sm:$0xf0]  ;;  %v2709_v20 = vor.u32 %v3703_v13, %v2708_v12  ;;  %v2636_v21 = vld [vmem:[#allocation5 + $0x80] sm:$0xf]  ;;  %v2573_v31 = vor.u32 %v3669_v18, %v2572_v17 }
  0x33   :  { %952 = vmatpush.bf16.msra.mxu1 %v2661_v57  ;;  %v3685_v22 = vld [vmem:[#allocation5 + $0x84] sm:$0xf0]  ;;  %v2700_v23 = vld [vmem:[#allocation5 + $0x100] sm:$0xf]  ;;  %v2773_v24 = vor.u32 %v3719_v15, %v2772_v14  ;;  %v2884_v28 = vld [vmem:[#allocation5 + $0x270] sm:$0xf] }
  0x34   :  { %965 = vmatpush.bf16.msra.mxu2 %v2725_v58  ;;  %v3701_v25 = vld [vmem:[#allocation5 + $0x104] sm:$0xf0]  ;;  %v2764_v26 = vld [vmem:[#allocation5 + $0x180] sm:$0xf]  ;;  %v3747_v29 = vld [vmem:[#allocation5 + $0x274] sm:$0xf0]  ;;  %v2637_v35 = vor.u32 %v3685_v22, %v2636_v21 }
  0x35   :  { %978 = vmatpush.bf16.msra.mxu3 %v2789_v62  ;;  %v3717_v27 = vld [vmem:[#allocation5 + $0x184] sm:$0xf0]  ;;  %v2948_v30 = vld [vmem:[#allocation5 + $0x2f0] sm:$0xf]  ;;  %v3763_v32 = vld [vmem:[#allocation5 + $0x2f4] sm:$0xf0]  ;;  %v2701_v36 = vor.u32 %v3701_v25, %v2700_v23  ;;  %v2885_v40 = vor.u32 %v3747_v29, %v2884_v28 }
  0x36   :  { %940 = vmatpush.bf16.msra.mxu0 %v2589_v4  ;;  %v3012_v33 = vld [vmem:[#allocation5 + $0x370] sm:$0xf]  ;;  %v3779_v34 = vld [vmem:[#allocation5 + $0x374] sm:$0xf0]  ;;  %v2765_v39 = vor.u32 %v3717_v27, %v2764_v26  ;;  %v2949_v41 = vor.u32 %v3763_v32, %v2948_v30  ;;  %v2876_v43 = vld [vmem:[#allocation5 + $0x260] sm:$0xf] }
  0x37   :  { %953 = vmatpush.bf16.msra.mxu1 %v2653_v5  ;;  %v3076_v37 = vld [vmem:[#allocation5 + $0x3f0] sm:$0xf]  ;;  %v3795_v38 = vld [vmem:[#allocation5 + $0x3f4] sm:$0xf0]  ;;  %v3013_v42 = vor.u32 %v3779_v34, %v3012_v33  ;;  %v3745_v44 = vld [vmem:[#allocation5 + $0x264] sm:$0xf0] }
  0x38   :  { %966 = vmatpush.bf16.msra.mxu2 %v2717_v6  ;;  %v2940_v45 = vld [vmem:[#allocation5 + $0x2e0] sm:$0xf]  ;;  %v3077_v46 = vor.u32 %v3795_v38, %v3076_v37  ;;  %v3761_v47 = vld [vmem:[#allocation5 + $0x2e4] sm:$0xf0]  ;;  %v2877_v52 = vor.u32 %v3745_v44, %v2876_v43  ;;  %v2868_v55 = vld [vmem:[#allocation5 + $0x250] sm:$0xf] }
  0x39   :  { %979 = vmatpush.bf16.msra.mxu3 %v2781_v10  ;;  %v3004_v48 = vld [vmem:[#allocation5 + $0x360] sm:$0xf]  ;;  %v3777_v49 = vld [vmem:[#allocation5 + $0x364] sm:$0xf0]  ;;  %v2941_v53 = vor.u32 %v3761_v47, %v2940_v45  ;;  %v3743_v56 = vld [vmem:[#allocation5 + $0x254] sm:$0xf0] }
  0x3a   :  { %941 = vmatpush.bf16.msra.mxu0 %v2581_v16  ;;  %v3068_v50 = vld [vmem:[#allocation5 + $0x3e0] sm:$0xf]  ;;  %v3793_v51 = vld [vmem:[#allocation5 + $0x3e4] sm:$0xf0]  ;;  %v3005_v54 = vor.u32 %v3777_v49, %v3004_v48  ;;  %v2932_v57 = vld [vmem:[#allocation5 + $0x2d0] sm:$0xf]  ;;  %v2869_v0 = vor.u32 %v3743_v56, %v2868_v55 }
  0x3b   :  { %954 = vmatpush.bf16.msra.mxu1 %v2645_v19  ;;  %v3069_v58 = vor.u32 %v3793_v51, %v3068_v50  ;;  %v3759_v59 = vld [vmem:[#allocation5 + $0x2d4] sm:$0xf0]  ;;  %v2996_v60 = vld [vmem:[#allocation5 + $0x350] sm:$0xf]  ;;  %v2860_v1 = vld [vmem:[#allocation5 + $0x240] sm:$0xf] }
  0x3c   :  { %967 = vmatpush.bf16.msra.mxu2 %v2709_v20  ;;  %v3775_v61 = vld [vmem:[#allocation5 + $0x354] sm:$0xf0]  ;;  %v3060_v62 = vld [vmem:[#allocation5 + $0x3d0] sm:$0xf]  ;;  %v2933_v3 = vor.u32 %v3759_v59, %v2932_v57  ;;  %v3741_v5 = vld [vmem:[#allocation5 + $0x244] sm:$0xf0] }
  0x3d   :  { %980 = vmatpush.bf16.msra.mxu3 %v2773_v24  ;;  %v3791_v63 = vld [vmem:[#allocation5 + $0x3d4] sm:$0xf0]  ;;  %v2997_v4 = vor.u32 %v3775_v61, %v2996_v60  ;;  %v2924_v6 = vld [vmem:[#allocation5 + $0x2c0] sm:$0xf]  ;;  %v3757_v8 = vld [vmem:[#allocation5 + $0x2c4] sm:$0xf0]  ;;  %v2861_v13 = vor.u32 %v3741_v5, %v2860_v1 }
  0x3e   :  { %942 = vmatpush.bf16.msra.mxu0 %v2573_v31  ;;  %v140_v2 = vld [vmem:[#allocation2] sm:$0xff]  ;;  %v3061_v7 = vor.u32 %v3791_v63, %v3060_v62  ;;  %v2988_v9 = vld [vmem:[#allocation5 + $0x340] sm:$0xf]  ;;  %v3773_v10 = vld [vmem:[#allocation5 + $0x344] sm:$0xf0]  ;;  %v2925_v14 = vor.u32 %v3757_v8, %v2924_v6  ;;  %s2557_s17 = sshll.u32 %s4532_s11, 4  ;;  %s2558_s17 = int_to_ptr.hbm [resolvable:$true] %s2557_s17 }
  0x3f   :  { %955 = vmatpush.bf16.msra.mxu1 %v2637_v35  ;;  %278 = vst [vmem:[#allocation1] ss:$9 sm:$0xff] %v140_v2  ;;  %v3052_v11 = vld [vmem:[#allocation5 + $0x3c0] sm:$0xf]  ;;  %v3789_v12 = vld [vmem:[#allocation5 + $0x3c4] sm:$0xf0]  ;;  %v2989_v15 = vor.u32 %v3773_v10, %v2988_v9 }
  0x40   :  { %968 = vmatpush.bf16.msra.mxu2 %v2701_v36  ;;  %v2852_v16 = vld [vmem:[#allocation5 + $0x230] sm:$0xf]  ;;  %v3739_v17 = vld [vmem:[#allocation5 + $0x234] sm:$0xf0]  ;;  %v3053_v19 = vor.u32 %v3789_v12, %v3052_v11  ;;  %v2844_v25 = vld [vmem:[#allocation5 + $0x220] sm:$0xf] }
  0x41   :  { %981 = vmatpush.bf16.msra.mxu3 %v2765_v39  ;;  %v2916_v18 = vld [vmem:[#allocation5 + $0x2b0] sm:$0xf]  ;;  %v3755_v20 = vld [vmem:[#allocation5 + $0x2b4] sm:$0xf0]  ;;  %v2853_v26 = vor.u32 %v3739_v17, %v2852_v16  ;;  %v3737_v32 = vld [vmem:[#allocation5 + $0x224] sm:$0xf0] }
  0x42   :  { %987 = vmatpush.bf16.msrb.mxu0 %v2885_v40  ;;  %v2980_v21 = vld [vmem:[#allocation5 + $0x330] sm:$0xf]  ;;  %v3771_v22 = vld [vmem:[#allocation5 + $0x334] sm:$0xf0]  ;;  %v2917_v30 = vor.u32 %v3755_v20, %v2916_v18  ;;  %v2908_v33 = vld [vmem:[#allocation5 + $0x2a0] sm:$0xf] }
  0x43   :  { %1000 = vmatpush.bf16.msrb.mxu1 %v2949_v41  ;;  %v3044_v23 = vld [vmem:[#allocation5 + $0x3b0] sm:$0xf]  ;;  %v3787_v24 = vld [vmem:[#allocation5 + $0x3b4] sm:$0xf0]  ;;  %v2981_v31 = vor.u32 %v3771_v22, %v2980_v21  ;;  %v3753_v36 = vld [vmem:[#allocation5 + $0x2a4] sm:$0xf0]  ;;  %v2845_v41 = vor.u32 %v3737_v32, %v2844_v25 }
  0x44   :  { %1013 = vmatpush.bf16.msrb.mxu2 %v3013_v42  ;;  %v3045_v35 = vor.u32 %v3787_v24, %v3044_v23  ;;  %v2972_v37 = vld [vmem:[#allocation5 + $0x320] sm:$0xf]  ;;  %v3769_v38 = vld [vmem:[#allocation5 + $0x324] sm:$0xf0]  ;;  %v2909_v42 = vor.u32 %v3753_v36, %v2908_v33  ;;  %v2836_v44 = vld [vmem:[#allocation5 + $0x210] sm:$0xf] }
  0x45   :  { %1026 = vmatpush.bf16.msrb.mxu3 %v3077_v46  ;;  %v3036_v39 = vld [vmem:[#allocation5 + $0x3a0] sm:$0xf]  ;;  %v3785_v40 = vld [vmem:[#allocation5 + $0x3a4] sm:$0xf0]  ;;  %v2973_v43 = vor.u32 %v3769_v38, %v2972_v37  ;;  %v3735_v45 = vld [vmem:[#allocation5 + $0x214] sm:$0xf0] }
  0x46   :  { %988 = vmatpush.bf16.msrb.mxu0 %v2877_v52  ;;  %v4297_v27 = vld [vmem:[#allocation1 + $0x12] sm:$0xff]  ;;  %v4299_v28 = vld [vmem:[#allocation1] sm:$0xff]  ;;  %v4303_v34 = vld [vmem:[#allocation1 + $0x9] sm:$0xff]  ;;  %v3037_v47 = vor.u32 %v3785_v40, %v3036_v39 }
  0x47   :  { %1001 = vmatpush.bf16.msrb.mxu1 %v2941_v53  ;;  %v4301_v29 = vld [vmem:[#allocation1 + $0x1b] sm:$0xff]  ;;  %969 = vmatmul.bf16.vlgmr.msra.gmra.mxu2 %v4297_v27  ;;  %v3751_v48 = vld [vmem:[#allocation5 + $0x294] sm:$0xf0]  ;;  %v2837_v53 = vor.u32 %v3735_v45, %v2836_v44  ;;  %v2956_v60 = vld [vmem:[#allocation5 + $0x300] sm:$0xf] }
  0x48   :  { %1014 = vmatpush.bf16.msrb.mxu2 %v3005_v54  ;;  %943 = vmatmul.bf16.vlgmr.msra.gmra.mxu0 %v4299_v28  ;;  %v2900_v46 = vld [vmem:[#allocation5 + $0x290] sm:$0xf]  ;;  %v3767_v50 = vld [vmem:[#allocation5 + $0x314] sm:$0xf0]  ;;  %v2828_v54 = vld [vmem:[#allocation5 + $0x200] sm:$0xf] }
  0x49   :  { %1027 = vmatpush.bf16.msrb.mxu3 %v3069_v58  ;;  %956 = vmatmul.bf16.vlgmr.msra.gmra.mxu1 %v4303_v34  ;;  %v2964_v49 = vld [vmem:[#allocation5 + $0x310] sm:$0xf]  ;;  %v3783_v52 = vld [vmem:[#allocation5 + $0x394] sm:$0xf0]  ;;  %v3733_v55 = vld [vmem:[#allocation5 + $0x204] sm:$0xf0]  ;;  %v2901_v56 = vor.u32 %v3751_v48, %v2900_v46 }
  0x4a   :  { %989 = vmatpush.bf16.msrb.mxu0 %v2869_v0  ;;  %982 = vmatmul.bf16.vlgmr.msra.gmra.mxu3 %v4301_v29  ;;  %v3028_v51 = vld [vmem:[#allocation5 + $0x390] sm:$0xf]  ;;  %v2965_v57 = vor.u32 %v3767_v50, %v2964_v49  ;;  %v2892_v58 = vld [vmem:[#allocation5 + $0x280] sm:$0xf]  ;;  %v3749_v59 = vld [vmem:[#allocation5 + $0x284] sm:$0xf0] }
  0x4b   :  { %1002 = vmatpush.bf16.msrb.mxu1 %v2933_v3  ;;  %v3029_v61 = vor.u32 %v3783_v52, %v3028_v51  ;;  %v3765_v62 = vld [vmem:[#allocation5 + $0x304] sm:$0xf0]  ;;  %v3020_v63 = vld [vmem:[#allocation5 + $0x380] sm:$0xf]  ;;  %v3682_v1 = vld [vmem:[#allocation5 + $0x74] sm:$0xf]  ;;  %v2893_v8 = vor.u32 %v3749_v59, %v2892_v58 }
  0x4c   :  { %1015 = vmatpush.bf16.msrb.mxu2 %v2997_v4  ;;  %v3781_v0 = vld [vmem:[#allocation5 + $0x384] sm:$0xf0]  ;;  %v2630_v2 = vld [vmem:[#allocation5 + $0x78] sm:$0xf0]  ;;  %v3698_v3 = vld [vmem:[#allocation5 + $0xf4] sm:$0xf]  ;;  %v2829_v4 = vor.u32 %v3733_v55, %v2828_v54  ;;  %v2957_v9 = vor.u32 %v3765_v62, %v2956_v60 }
  0x4d   :  { %1028 = vmatpush.bf16.msrb.mxu3 %v3061_v7  ;;  %v2694_v5 = vld [vmem:[#allocation5 + $0xf8] sm:$0xf0]  ;;  %v3714_v6 = vld [vmem:[#allocation5 + $0x174] sm:$0xf]  ;;  %v3021_v12 = vor.u32 %v3781_v0, %v3020_v63  ;;  %v3680_v16 = vld [vmem:[#allocation5 + $0x64] sm:$0xf] }
  0x4e   :  { %990 = vmatpush.bf16.msrb.mxu0 %v2861_v13  ;;  %v2758_v7 = vld [vmem:[#allocation5 + $0x178] sm:$0xf0]  ;;  %v3730_v10 = vld [vmem:[#allocation5 + $0x1f4] sm:$0xf]  ;;  %v2633_v13 = vor.u32 %v3682_v1, %v2630_v2  ;;  %v2622_v17 = vld [vmem:[#allocation5 + $0x68] sm:$0xf0] }
  0x4f   :  { %1003 = vmatpush.bf16.msrb.mxu1 %v2925_v14  ;;  %v2822_v11 = vld [vmem:[#allocation5 + $0x1f8] sm:$0xf0]  ;;  %v2697_v14 = vor.u32 %v3698_v3, %v2694_v5  ;;  %v3696_v18 = vld [vmem:[#allocation5 + $0xe4] sm:$0xf]  ;;  %v2686_v20 = vld [vmem:[#allocation5 + $0xe8] sm:$0xf0] }
  0x50   :  { %1016 = vmatpush.bf16.msrb.mxu2 %v2989_v15  ;;  %v2761_v15 = vor.u32 %v3714_v6, %v2758_v7  ;;  %v3712_v21 = vld [vmem:[#allocation5 + $0x164] sm:$0xf]  ;;  %v2750_v22 = vld [vmem:[#allocation5 + $0x168] sm:$0xf0]  ;;  %v2689_v33 = vor.u32 %v3696_v18, %v2686_v20  ;;  %v2614_v36 = vld [vmem:[#allocation5 + $0x58] sm:$0xf0] }
  0x51   :  { %1029 = vmatpush.bf16.msrb.mxu3 %v3053_v19  ;;  %v2825_v19 = vor.u32 %v3730_v10, %v2822_v11  ;;  %v3728_v23 = vld [vmem:[#allocation5 + $0x1e4] sm:$0xf]  ;;  %v2814_v24 = vld [vmem:[#allocation5 + $0x1e8] sm:$0xf0]  ;;  %v3694_v37 = vld [vmem:[#allocation5 + $0xd4] sm:$0xf] }
  0x52   :  { %991 = vmatpush.bf16.msrb.mxu0 %v2853_v26  ;;  %v4309_v25 = vld [vmem:[#allocation1 + $0x36] sm:$0xff]  ;;  %v2625_v26 = vor.u32 %v3680_v16, %v2622_v17  ;;  %v4313_v32 = vld [vmem:[#allocation1 + $0x3f] sm:$0xff]  ;;  %v4315_v38 = vld [vmem:[#allocation1 + $0x2d] sm:$0xff]  ;;  %v2817_v39 = vor.u32 %v3728_v23, %v2814_v24 }
  0x53   :  { %1004 = vmatpush.bf16.msrb.mxu1 %v2917_v30  ;;  %v3678_v30 = vld [vmem:[#allocation5 + $0x54] sm:$0xf]  ;;  %v2678_v40 = vld [vmem:[#allocation5 + $0xd8] sm:$0xf0]  ;;  %v3676_v48 = vld [vmem:[#allocation5 + $0x44] sm:$0xf] }
  0x54   :  { %1017 = vmatpush.bf16.msrb.mxu2 %v2981_v31  ;;  %v4311_v31 = vld [vmem:[#allocation1 + $0x24] sm:$0xff]  ;;  %v2806_v44 = vld [vmem:[#allocation5 + $0x1d8] sm:$0xf0]  ;;  %v2617_v45 = vor.u32 %v3678_v30, %v2614_v36  ;;  %v2681_v46 = vor.u32 %v3694_v37, %v2678_v40  ;;  %v2606_v49 = vld [vmem:[#allocation5 + $0x48] sm:$0xf0] }
  0x55   :  { %1030 = vmatpush.bf16.msrb.mxu3 %v3045_v35  ;;  %v2753_v35 = vor.u32 %v3712_v21, %v2750_v22  ;;  %v3692_v50 = vld [vmem:[#allocation5 + $0xc4] sm:$0xf]  ;;  %v2670_v52 = vld [vmem:[#allocation5 + $0xc8] sm:$0xf0]  ;;  %v3674_v60 = vld [vmem:[#allocation5 + $0x34] sm:$0xf] }
  0x56   :  { %992 = vmatpush.bf16.msrb.mxu0 %v2845_v41  ;;  %v3710_v41 = vld [vmem:[#allocation5 + $0x154] sm:$0xf]  ;;  %v2734_v54 = vld [vmem:[#allocation5 + $0x148] sm:$0xf0]  ;;  %v3724_v55 = vld [vmem:[#allocation5 + $0x1c4] sm:$0xf]  ;;  %v2673_v58 = vor.u32 %v3692_v50, %v2670_v52 }
  0x57   :  { %1005 = vmatpush.bf16.msrb.mxu1 %v2909_v42  ;;  %v2742_v42 = vld [vmem:[#allocation5 + $0x158] sm:$0xf0]  ;;  %v3690_v62 = vld [vmem:[#allocation5 + $0xb4] sm:$0xf]  ;;  %v3688_v10 = vld [vmem:[#allocation5 + $0xa4] sm:$0xf] }
  0x58   :  { %1018 = vmatpush.bf16.msrb.mxu2 %v2973_v43  ;;  %v3726_v43 = vld [vmem:[#allocation5 + $0x1d4] sm:$0xf]  ;;  %v2662_v0 = vld [vmem:[#allocation5 + $0xb8] sm:$0xf0]  ;;  %v2782_v16 = vld [vmem:[#allocation5 + $0x1a8] sm:$0xf0] }
  0x59   :  { %1031 = vmatpush.bf16.msrb.mxu3 %v3037_v47  ;;  %v2745_v47 = vor.u32 %v3710_v41, %v2742_v42  ;;  %v2809_v51 = vor.u32 %v3726_v43, %v2806_v44  ;;  %v3706_v1 = vld [vmem:[#allocation5 + $0x134] sm:$0xf]  ;;  %v2726_v2 = vld [vmem:[#allocation5 + $0x138] sm:$0xf0]  ;;  %v2665_v6 = vor.u32 %v3690_v62, %v2662_v0  ;;  %v3668_v36 = vld [vmem:[#allocation5 + $0x4] sm:$0xf] }
  0x5a   :  { %993 = vmatpush.bf16.msrb.mxu0 %v2837_v53  ;;  %v3708_v53 = vld [vmem:[#allocation5 + $0x144] sm:$0xf]  ;;  %v3722_v3 = vld [vmem:[#allocation5 + $0x1b4] sm:$0xf]  ;;  %v2729_v7 = vor.u32 %v3706_v1, %v2726_v2  ;;  %v2582_v21 = vld [vmem:[#allocation5 + $0x18] sm:$0xf0] }
  0x5b   :  { %1006 = vmatpush.bf16.msrb.mxu1 %v2901_v56  ;;  %v2798_v56 = vld [vmem:[#allocation5 + $0x1c8] sm:$0xf0]  ;;  %v2737_v59 = vor.u32 %v3708_v53, %v2734_v54  ;;  %v3670_v18 = vld [vmem:[#allocation5 + $0x14] sm:$0xf]  ;;  %v2646_v23 = vld [vmem:[#allocation5 + $0x98] sm:$0xf0] }
  0x5c   :  { %1019 = vmatpush.bf16.msrb.mxu2 %v2965_v57  ;;  %v2609_v57 = vor.u32 %v3676_v48, %v2606_v49  ;;  %v2801_v63 = vor.u32 %v3724_v55, %v2798_v56  ;;  %v3686_v22 = vld [vmem:[#allocation5 + $0x94] sm:$0xf]  ;;  %v2710_v30 = vld [vmem:[#allocation5 + $0x118] sm:$0xf0]  ;;  %v2574_v37 = vld [vmem:[#allocation5 + $0x8] sm:$0xf0] }
  0x5d   :  { %1032 = vmatpush.bf16.msrb.mxu3 %v3029_v61  ;;  %v2598_v61 = vld [vmem:[#allocation5 + $0x38] sm:$0xf0]  ;;  %v3684_v40 = vld [vmem:[#allocation5 + $0x84] sm:$0xf]  ;;  %v2638_v41 = vld [vmem:[#allocation5 + $0x88] sm:$0xf0]  ;;  %v2649_v44 = vor.u32 %v3686_v22, %v2646_v23  ;;  %v2577_v53 = vor.u32 %v3668_v36, %v2574_v37 }
  0x5e   :  { %994 = vmatpush.bf16.msrb.mxu0 %v2829_v4  ;;  %v2790_v4 = vld [vmem:[#allocation5 + $0x1b8] sm:$0xf0]  ;;  %v2601_v5 = vor.u32 %v3674_v60, %v2598_v61  ;;  %v3700_v42 = vld [vmem:[#allocation5 + $0x104] sm:$0xf]  ;;  %v2702_v43 = vld [vmem:[#allocation5 + $0x108] sm:$0xf0]  ;;  %v2641_v56 = vor.u32 %v3684_v40, %v2638_v41 }
  0x5f   :  { %1007 = vmatpush.bf16.msrb.mxu1 %v2893_v8  ;;  %v3672_v8 = vld [vmem:[#allocation5 + $0x24] sm:$0xf]  ;;  %v2793_v11 = vor.u32 %v3722_v3, %v2790_v4  ;;  %v3746_v48 = vld [vmem:[#allocation5 + $0x274] sm:$0xf]  ;;  %v2886_v50 = vld [vmem:[#allocation5 + $0x278] sm:$0xf0] }
  0x60   :  { %1020 = vmatpush.bf16.msrb.mxu2 %v2957_v9  ;;  %v2590_v9 = vld [vmem:[#allocation5 + $0x28] sm:$0xf0]  ;;  %v2950_v52 = vld [vmem:[#allocation5 + $0x2f8] sm:$0xf0]  ;;  %v3778_v54 = vld [vmem:[#allocation5 + $0x374] sm:$0xf]  ;;  %v2889_v61 = vor.u32 %v3746_v48, %v2886_v50 }
  0x61   :  { %1033 = vmatpush.bf16.msrb.mxu3 %v3021_v12  ;;  %995 = vmatmul.bf16.vlgmr.msrb.gmra.mxu0 %v4311_v31  ;;  %v2654_v12 = vld [vmem:[#allocation5 + $0xa8] sm:$0xf0]  ;;  %v2593_v17 = vor.u32 %v3672_v8, %v2590_v9  ;;  %v3014_v55 = vld [vmem:[#allocation5 + $0x378] sm:$0xf0]  ;;  %v3744_v0 = vld [vmem:[#allocation5 + $0x264] sm:$0xf] }
  0x62   :  { %1039 = vmatpush.bf16.msra.mxu0 %v2633_v13  ;;  %1008 = vmatmul.bf16.vlgmr.msrb.gmra.mxu1 %v4315_v38  ;;  %v3704_v13 = vld [vmem:[#allocation5 + $0x124] sm:$0xf]  ;;  %v2878_v1 = vld [vmem:[#allocation5 + $0x268] sm:$0xf0]  ;;  %v3738_v40 = vld [vmem:[#allocation5 + $0x234] sm:$0xf] }
  0x63   :  { %1052 = vmatpush.bf16.msra.mxu1 %v2697_v14  ;;  %1021 = vmatmul.bf16.vlgmr.msrb.gmra.mxu2 %v4309_v25  ;;  %v2718_v14 = vld [vmem:[#allocation5 + $0x128] sm:$0xf0]  ;;  %v3760_v2 = vld [vmem:[#allocation5 + $0x2e4] sm:$0xf]  ;;  %v2881_v9 = vor.u32 %v3744_v0, %v2878_v1  ;;  %v2854_v41 = vld [vmem:[#allocation5 + $0x238] sm:$0xf0] }
  0x64   :  { %1065 = vmatpush.bf16.msra.mxu2 %v2761_v15  ;;  %1034 = vmatmul.bf16.vlgmr.msrb.gmra.mxu3 %v4313_v32  ;;  %v3720_v15 = vld [vmem:[#allocation5 + $0x1a4] sm:$0xf]  ;;  %v2721_v20 = vor.u32 %v3704_v13, %v2718_v14  ;;  %v2942_v4 = vld [vmem:[#allocation5 + $0x2e8] sm:$0xf0]  ;;  %v2870_v13 = vld [vmem:[#allocation5 + $0x258] sm:$0xf0] }
  0x65   :  { %1078 = vmatpush.bf16.msra.mxu3 %v2825_v19  ;;  %v2657_v19 = vor.u32 %v3688_v10, %v2654_v12  ;;  %v2785_v24 = vor.u32 %v3720_v15, %v2782_v16  ;;  %v3070_v8 = vld [vmem:[#allocation5 + $0x3e8] sm:$0xf0]  ;;  %v2945_v10 = vor.u32 %v3760_v2, %v2942_v4  ;;  %v3742_v12 = vld [vmem:[#allocation5 + $0x254] sm:$0xf]  ;;  %v2934_v16 = vld [vmem:[#allocation5 + $0x2d8] sm:$0xf0] }
  0x66   :  { %1040 = vmatpush.bf16.msra.mxu0 %v2625_v26  ;;  %v3702_v26 = vld [vmem:[#allocation5 + $0x114] sm:$0xf]  ;;  %v2990_v36 = vld [vmem:[#allocation5 + $0x348] sm:$0xf0]  ;;  %v3788_v37 = vld [vmem:[#allocation5 + $0x3c4] sm:$0xf] }
  0x67   :  { %1053 = vmatpush.bf16.msra.mxu1 %v2689_v33  ;;  %v3718_v33 = vld [vmem:[#allocation5 + $0x194] sm:$0xf]  ;;  %v3046_v48 = vld [vmem:[#allocation5 + $0x3b8] sm:$0xf0] }
  0x68   :  { %1066 = vmatpush.bf16.msra.mxu2 %v2753_v35  ;;  %v2774_v35 = vld [vmem:[#allocation5 + $0x198] sm:$0xf0]  ;;  %v3758_v14 = vld [vmem:[#allocation5 + $0x2d4] sm:$0xf] }
  0x69   :  { %1079 = vmatpush.bf16.msra.mxu3 %v2817_v39  ;;  %v2585_v39 = vor.u32 %v3670_v18, %v2582_v21  ;;  %v2777_v49 = vor.u32 %v3718_v33, %v2774_v35  ;;  %v2998_v18 = vld [vmem:[#allocation5 + $0x358] sm:$0xf0]  ;;  %v2873_v21 = vor.u32 %v3742_v12, %v2870_v13  ;;  %v2937_v22 = vor.u32 %v3758_v14, %v2934_v16  ;;  %v2926_v33 = vld [vmem:[#allocation5 + $0x2c8] sm:$0xf0]  ;;  %v3772_v35 = vld [vmem:[#allocation5 + $0x344] sm:$0xf] }
  0x6a   :  { %1041 = vmatpush.bf16.msra.mxu0 %v2617_v45  ;;  %v2713_v45 = vor.u32 %v3702_v26, %v2710_v30  ;;  %v2862_v26 = vld [vmem:[#allocation5 + $0x248] sm:$0xf0]  ;;  %v3734_v0 = vld [vmem:[#allocation5 + $0x214] sm:$0xf]  ;;  %v2838_v1 = vld [vmem:[#allocation5 + $0x218] sm:$0xf0] }
  0x6b   :  { %1054 = vmatpush.bf16.msra.mxu1 %v2681_v46  ;;  %v3716_v46 = vld [vmem:[#allocation5 + $0x184] sm:$0xf]  ;;  %v3750_v2 = vld [vmem:[#allocation5 + $0x294] sm:$0xf]  ;;  %v2902_v4 = vld [vmem:[#allocation5 + $0x298] sm:$0xf0] }
  0x6c   :  { %1067 = vmatpush.bf16.msra.mxu2 %v2745_v47  ;;  %v2766_v47 = vld [vmem:[#allocation5 + $0x188] sm:$0xf0]  ;;  %v3732_v12 = vld [vmem:[#allocation5 + $0x204] sm:$0xf] }
  0x6d   :  { %1080 = vmatpush.bf16.msra.mxu3 %v2809_v51  ;;  %v3762_v51 = vld [vmem:[#allocation5 + $0x2f4] sm:$0xf]  ;;  %v2769_v60 = vor.u32 %v3716_v46, %v2766_v47  ;;  %v2982_v46 = vld [vmem:[#allocation5 + $0x338] sm:$0xf0]  ;;  %v2830_v13 = vld [vmem:[#allocation5 + $0x208] sm:$0xf0] }
  0x6e   :  { %1042 = vmatpush.bf16.msra.mxu0 %v2609_v57  ;;  %v2705_v57 = vor.u32 %v3700_v42, %v2702_v43  ;;  %v2953_v62 = vor.u32 %v3762_v51, %v2950_v52  ;;  %v3754_v42 = vld [vmem:[#allocation5 + $0x2b4] sm:$0xf]  ;;  %v3736_v52 = vld [vmem:[#allocation5 + $0x224] sm:$0xf]  ;;  %v2894_v16 = vld [vmem:[#allocation5 + $0x288] sm:$0xf0] }
  0x6f   :  { %1055 = vmatpush.bf16.msra.mxu1 %v2673_v58  ;;  %v3794_v58 = vld [vmem:[#allocation5 + $0x3f4] sm:$0xf]  ;;  %v3748_v14 = vld [vmem:[#allocation5 + $0x284] sm:$0xf] }
  0x70   :  { %1068 = vmatpush.bf16.msra.mxu2 %v2737_v59  ;;  %v3078_v59 = vld [vmem:[#allocation5 + $0x3f8] sm:$0xf0]  ;;  %v3786_v47 = vld [vmem:[#allocation5 + $0x3b4] sm:$0xf] }
  0x71   :  { %1081 = vmatpush.bf16.msra.mxu3 %v2801_v63  ;;  %v3017_v63 = vor.u32 %v3778_v54, %v3014_v55  ;;  %v3081_v3 = vor.u32 %v3794_v58, %v3078_v59  ;;  %v3752_v54 = vld [vmem:[#allocation5 + $0x2a4] sm:$0xf]  ;;  %v3049_v55 = vor.u32 %v3786_v47, %v3046_v48  ;;  %v2974_v58 = vld [vmem:[#allocation5 + $0x328] sm:$0xf0] }
  0x72   :  { %1043 = vmatpush.bf16.msra.mxu0 %v2601_v5  ;;  %v3776_v5 = vld [vmem:[#allocation5 + $0x364] sm:$0xf] }
  0x73   :  { %1056 = vmatpush.bf16.msra.mxu1 %v2665_v6  ;;  %v3006_v6 = vld [vmem:[#allocation5 + $0x368] sm:$0xf0]  ;;  %v3784_v59 = vld [vmem:[#allocation5 + $0x3a4] sm:$0xf] }
  0x74   :  { %1069 = vmatpush.bf16.msra.mxu2 %v2729_v7  ;;  %v3792_v7 = vld [vmem:[#allocation5 + $0x3e4] sm:$0xf] }
  0x75   :  { %1082 = vmatpush.bf16.msra.mxu3 %v2793_v11  ;;  %v3009_v11 = vor.u32 %v3776_v5, %v3006_v6  ;;  %v3073_v15 = vor.u32 %v3792_v7, %v3070_v8  ;;  %v3766_v5 = vld [vmem:[#allocation5 + $0x314] sm:$0xf]  ;;  %v2966_v6 = vld [vmem:[#allocation5 + $0x318] sm:$0xf0] }
  0x76   :  { %1044 = vmatpush.bf16.msra.mxu0 %v2593_v17  ;;  %v3774_v17 = vld [vmem:[#allocation5 + $0x354] sm:$0xf]  ;;  %v3030_v8 = vld [vmem:[#allocation5 + $0x398] sm:$0xf0] }
  0x77   :  { %1057 = vmatpush.bf16.msra.mxu1 %v2657_v19  ;;  %v3790_v19 = vld [vmem:[#allocation5 + $0x3d4] sm:$0xf]  ;;  %v3001_v23 = vor.u32 %v3774_v17, %v2998_v18  ;;  %v3764_v17 = vld [vmem:[#allocation5 + $0x304] sm:$0xf]  ;;  %v2958_v18 = vld [vmem:[#allocation5 + $0x308] sm:$0xf0] }
  0x78   :  { %1070 = vmatpush.bf16.msra.mxu2 %v2721_v20  ;;  %v3062_v20 = vld [vmem:[#allocation5 + $0x3d8] sm:$0xf0]  ;;  %v3782_v7 = vld [vmem:[#allocation5 + $0x394] sm:$0xf] }
  0x79   :  { %1083 = vmatpush.bf16.msra.mxu3 %v2785_v24  ;;  %v3740_v24 = vld [vmem:[#allocation5 + $0x244] sm:$0xf]  ;;  %v3065_v30 = vor.u32 %v3790_v19, %v3062_v20  ;;  %v3022_v20 = vld [vmem:[#allocation5 + $0x388] sm:$0xf0] }
  0x7a   :  { %1045 = vmatpush.bf16.msra.mxu0 %v2585_v39  ;;  %v3780_v19 = vld [vmem:[#allocation5 + $0x384] sm:$0xf] }
  0x7b   :  { %1058 = vmatpush.bf16.msra.mxu1 %v2649_v44  ;;  %v2918_v44 = vld [vmem:[#allocation5 + $0x2b8] sm:$0xf0] }
  0x7c   :  { %1071 = vmatpush.bf16.msra.mxu2 %v2713_v45  ;;  %v3770_v45 = vld [vmem:[#allocation5 + $0x334] sm:$0xf]  ;;  %v2921_v50 = vor.u32 %v3754_v42, %v2918_v44 }
  0x7d   :  { %1084 = vmatpush.bf16.msra.mxu3 %v2777_v49  ;;  %v2857_v49 = vor.u32 %v3738_v40, %v2854_v41  ;;  %v2985_v51 = vor.u32 %v3770_v45, %v2982_v46 }
  0x7e   :  { %1046 = vmatpush.bf16.msra.mxu0 %v2577_v53  ;;  %v2846_v53 = vld [vmem:[#allocation5 + $0x228] sm:$0xf0] }
  0x7f   :  { %1059 = vmatpush.bf16.msra.mxu1 %v2641_v56  ;;  %v2910_v56 = vld [vmem:[#allocation5 + $0x2a8] sm:$0xf0] }
  0x80   :  { %1072 = vmatpush.bf16.msra.mxu2 %v2705_v57  ;;  %v3768_v57 = vld [vmem:[#allocation5 + $0x324] sm:$0xf] }
  0x81   :  { %1085 = vmatpush.bf16.msra.mxu3 %v2769_v60  ;;  %1047 = vmatmul.bf16.vlgmr.msra.gmra.mxu0 %v4299_v28  ;;  %v3054_v28 = vld [vmem:[#allocation5 + $0x3c8] sm:$0xf0] }
  0x82   :  { %1091 = vmatpush.bf16.msrb.mxu0 %v2889_v61  ;;  %1060 = vmatmul.bf16.vlgmr.msra.gmra.mxu1 %v4303_v34  ;;  %v2993_v34 = vor.u32 %v3772_v35, %v2990_v36  ;;  %v3057_v43 = vor.u32 %v3788_v37, %v3054_v28  ;;  %v3038_v60 = vld [vmem:[#allocation5 + $0x3a8] sm:$0xf0]  ;;  %v2849_v61 = vor.u32 %v3736_v52, %v2846_v53 }
  0x83   :  { %1104 = vmatpush.bf16.msrb.mxu1 %v2953_v62  ;;  %1073 = vmatmul.bf16.vlgmr.msra.gmra.mxu2 %v4297_v27  ;;  %v3756_v27 = vld [vmem:[#allocation5 + $0x2c4] sm:$0xf]  ;;  %v2913_v62 = vor.u32 %v3752_v54, %v2910_v56 }
  0x84   :  { %1117 = vmatpush.bf16.msrb.mxu2 %v3017_v63  ;;  %1086 = vmatmul.bf16.vlgmr.msra.gmra.mxu3 %v4301_v29  ;;  %v2865_v29 = vor.u32 %v3740_v24, %v2862_v26  ;;  %v2929_v39 = vor.u32 %v3756_v27, %v2926_v33  ;;  %v2977_v63 = vor.u32 %v3768_v57, %v2974_v58  ;;  %v269_v26 = vld [vmem:[#allocation7] sm:$0x3] }
  0x85   :  { %1130 = vmatpush.bf16.msrb.mxu3 %v3081_v3  ;;  %v3041_v3 = vor.u32 %v3784_v59, %v3038_v60  ;;  %v3025_v24 = vor.u32 %v3780_v19, %v3022_v20  ;;  %v273_v27 = vperm.slane %v269_v26, 0  ;;  %v274_v57 = vperm.slane %v269_v26, 1  ;;  %v3141_v59 = vld [vmem:[#allocation10 + $0x70] sm:$0xf]  ;;  %v3811_v60 = vld [vmem:[#allocation10 + $0x74] sm:$0xf0] }
  0x86   :  { %1092 = vmatpush.bf16.msrb.mxu0 %v2881_v9  ;;  %v2841_v9 = vor.u32 %v3734_v0, %v2838_v1  ;;  %v3143_v0 = vld [vmem:[#allocation10 + $0x78] sm:$0xf0]  ;;  %v3804_v19 = vld [vmem:[#allocation10 + $0x44] sm:$0xf] }
  0x87   :  { %1105 = vmatpush.bf16.msrb.mxu1 %v2945_v10  ;;  %v2905_v10 = vor.u32 %v3750_v2, %v2902_v4  ;;  %v3809_v4 = vld [vmem:[#allocation10 + $0x64] sm:$0xf0] }
  0x88   :  { %1118 = vmatpush.bf16.msrb.mxu2 %v3009_v11  ;;  %v2969_v11 = vor.u32 %v3766_v5, %v2966_v6  ;;  %v3808_v5 = vld [vmem:[#allocation10 + $0x64] sm:$0xf] }
  0x89   :  { %1131 = vmatpush.bf16.msrb.mxu3 %v3073_v15  ;;  %v3033_v15 = vor.u32 %v3782_v7, %v3030_v8  ;;  %v3135_v7 = vld [vmem:[#allocation10 + $0x68] sm:$0xf0] }
  0x8a   :  { %1093 = vmatpush.bf16.msrb.mxu0 %v2873_v21  ;;  %v2833_v21 = vor.u32 %v3732_v12, %v2830_v13  ;;  %v3138_v8 = vor.u32 %v3808_v5, %v3135_v7  ;;  %v3806_v12 = vld [vmem:[#allocation10 + $0x54] sm:$0xf] }
  0x8b   :  { %1106 = vmatpush.bf16.msrb.mxu1 %v2937_v22  ;;  %v2897_v22 = vor.u32 %v3748_v14, %v2894_v16  ;;  %v3127_v14 = vld [vmem:[#allocation10 + $0x58] sm:$0xf0] }
  0x8c   :  { %1119 = vmatpush.bf16.msrb.mxu2 %v3001_v23  ;;  %v2961_v23 = vor.u32 %v3764_v17, %v2958_v18  ;;  %v3117_v17 = vld [vmem:[#allocation10 + $0x40] sm:$0xf]  ;;  %v3805_v18 = vld [vmem:[#allocation10 + $0x44] sm:$0xf0] }
  0x8d   :  { %1132 = vmatpush.bf16.msrb.mxu3 %v3065_v30  ;;  %v3118_v20 = vor.u32 %v3805_v18, %v3117_v17  ;;  %v3542_v17 = vld [vmem:[#allocation11 + $0x308] sm:$0xf] }
  0x8e   :  { %1094 = vmatpush.bf16.msrb.mxu0 %v2865_v29  ;;  %v3917_v18 = vld [vmem:[#allocation11 + $0x344] sm:$0xf0] }
  0x8f   :  { %1107 = vmatpush.bf16.msrb.mxu1 %v2929_v39 }
  0x90   :  { %1120 = vmatpush.bf16.msrb.mxu2 %v2993_v34 }
  0x91   :  { %1133 = vmatpush.bf16.msrb.mxu3 %v3057_v43 }
  0x92   :  { %1095 = vmatpush.bf16.msrb.mxu0 %v2857_v49 }
  0x93   :  { %1108 = vmatpush.bf16.msrb.mxu1 %v2921_v50 }
  0x94   :  { %1121 = vmatpush.bf16.msrb.mxu2 %v2985_v51 }
  0x95   :  { %1134 = vmatpush.bf16.msrb.mxu3 %v3049_v55 }
  0x96   :  { %1096 = vmatpush.bf16.msrb.mxu0 %v2849_v61  ;;  %v3810_v61 = vld [vmem:[#allocation10 + $0x74] sm:$0xf] }
  0x97   :  { %1109 = vmatpush.bf16.msrb.mxu1 %v2913_v62  ;;  %v3146_v1 = vor.u32 %v3810_v61, %v3143_v0  ;;  %v3924_v0 = vld [vmem:[#allocation11 + $0x384] sm:$0xf] }
  0x98   :  { %1122 = vmatpush.bf16.msrb.mxu2 %v2977_v63  ;;  %v3142_v63 = vor.u32 %v3811_v60, %v3141_v59 }
  0x99   :  { %1135 = vmatpush.bf16.msrb.mxu3 %v3041_v3  ;;  %v3133_v3 = vld [vmem:[#allocation10 + $0x60] sm:$0xf] }
  0x9a   :  { %1097 = vmatpush.bf16.msrb.mxu0 %v2841_v9  ;;  %v3134_v6 = vor.u32 %v3809_v4, %v3133_v3  ;;  %v3606_v3 = vld [vmem:[#allocation11 + $0x388] sm:$0xf] }
  0x9b   :  { %1110 = vmatpush.bf16.msrb.mxu1 %v2905_v10  ;;  %v3125_v10 = vld [vmem:[#allocation10 + $0x50] sm:$0xf]  ;;  %v3933_v4 = vld [vmem:[#allocation11 + $0x3c4] sm:$0xf0] }
  0x9c   :  { %1123 = vmatpush.bf16.msrb.mxu2 %v2969_v11  ;;  %v3807_v11 = vld [vmem:[#allocation10 + $0x54] sm:$0xf0]  ;;  %v3607_v7 = vor.u32 %v3933_v4, %v3606_v3 }
  0x9d   :  { %1136 = vmatpush.bf16.msrb.mxu3 %v3033_v15  ;;  %v3126_v13 = vor.u32 %v3807_v11, %v3125_v10  ;;  %v3130_v15 = vor.u32 %v3806_v12, %v3127_v14  ;;  %v3534_v10 = vld [vmem:[#allocation11 + $0x300] sm:$0xf]  ;;  %v3908_v14 = vld [vmem:[#allocation11 + $0x304] sm:$0xf] }
  0x9e   :  { %1098 = vmatpush.bf16.msrb.mxu0 %v2833_v21  ;;  %v3119_v21 = vld [vmem:[#allocation10 + $0x48] sm:$0xf0] }
  0x9f   :  { %1111 = vmatpush.bf16.msrb.mxu1 %v2897_v22  ;;  %v3122_v22 = vor.u32 %v3804_v19, %v3119_v21  ;;  %v3909_v19 = vld [vmem:[#allocation11 + $0x30c] sm:$0xf]  ;;  %v3543_v21 = vor.u32 %v3917_v18, %v3542_v17  ;;  %v3280_v18 = vld [vmem:[#allocation11 + $0x140] sm:$0xf0] }
  0xa0   :  { %1124 = vmatpush.bf16.msrb.mxu2 %v2961_v23 }
  0xa1   :  { %1137 = vmatpush.bf16.msrb.mxu3 %v3025_v24  ;;  %1099 = vmatmul.bf16.vlgmr.msrb.gmra.mxu0 %v4311_v31 }
  0xa2   :  { %1112 = vmatmul.bf16.vlgmr.msrb.gmra.mxu1 %v4315_v38  ;;  %1278 = vmatpush.bf16.msra.mxu0 %v3142_v63  ;;  %v3932_v63 = vld [vmem:[#allocation11 + $0x3bc] sm:$0xf0] }
  0xa3   :  { %1125 = vmatmul.bf16.vlgmr.msrb.gmra.mxu2 %v4309_v25  ;;  %1291 = vmatpush.bf16.msra.mxu1 %v3146_v1 }
  0xa4   :  { %1138 = vmatmul.bf16.vlgmr.msrb.gmra.mxu3 %v4313_v32 }
  0xa6   :  { %1279 = vmatpush.bf16.msra.mxu0 %v3134_v6 }
  0xa7   :  { %1292 = vmatpush.bf16.msra.mxu1 %v3138_v8  ;;  %v3925_v8 = vld [vmem:[#allocation11 + $0x38c] sm:$0xf] }
  0xaa   :  { %1280 = vmatpush.bf16.msra.mxu0 %v3126_v13  ;;  %v3916_v13 = vld [vmem:[#allocation11 + $0x33c] sm:$0xf0] }
  0xab   :  { %1293 = vmatpush.bf16.msra.mxu1 %v3130_v15  ;;  %v3535_v15 = vor.u32 %v3916_v13, %v3534_v10  ;;  %v3953_v10 = vld [vmem:[#allocation8] ss:$0 sm:$0xff] }
  0xae   :  { %1281 = vmatpush.bf16.msra.mxu0 %v3118_v20 }
  0xaf   :  { %1294 = vmatpush.bf16.msra.mxu1 %v3122_v22  ;;  %v3544_v22 = vld [vmem:[#allocation11 + $0x348] sm:$0xf0] }
  0xc5   :  { %v944_v30 = vpop.f32.mrf.mxu0 }
  0xc6   :  { %v945_v33 = vadd.f32 %v944_v30, %v273_v27  ;;  %v957_v35 = vpop.f32.mrf.mxu1  ;;  %v3109_v27 = vld [vmem:[#allocation10 + $0x30] sm:$0xf]  ;;  %v3803_v30 = vld [vmem:[#allocation10 + $0x34] sm:$0xf0] }
  0xc8   :  { %v958_v36 = vadd.f32 %v957_v35, %v945_v33  ;;  %v3802_v33 = vld [vmem:[#allocation10 + $0x34] sm:$0xf] }
  0xca   :  { %v970_v37 = vpop.f32.mrf.mxu2 }
  0xcb   :  { %v971_v28 = vadd.f32 %v970_v37, %v958_v36  ;;  %v3110_v36 = vor.u32 %v3803_v30, %v3109_v27  ;;  %v3111_v37 = vld [vmem:[#allocation10 + $0x38] sm:$0xf0]  ;;  %v3892_v30 = vld [vmem:[#allocation11 + $0x284] sm:$0xf] }
  0xcd   :  { %v983_v29 = vpop.f32.mrf.mxu3  ;;  %v946_v34 = vpop.f32.mrf.mxu0  ;;  %1282 = vmatpush.bf16.msra.mxu0 %v3110_v36  ;;  %v3478_v36 = vld [vmem:[#allocation11 + $0x288] sm:$0xf] }
  0xce   :  { %v984_v39 = vadd.f32 %v983_v29, %v971_v28  ;;  %v959_v40 = vpop.f32.mrf.mxu1  ;;  %v3101_v28 = vld [vmem:[#allocation10 + $0x20] sm:$0xf]  ;;  %v3801_v29 = vld [vmem:[#allocation10 + $0x24] sm:$0xf0]  ;;  %v3800_v34 = vld [vmem:[#allocation10 + $0x24] sm:$0xf] }
  0xcf   :  { %v3103_v40 = vld [vmem:[#allocation10 + $0x28] sm:$0xf0] }
  0xd2   :  { %v972_v41 = vpop.f32.mrf.mxu2 }
  0xd3   :  { %v3102_v41 = vor.u32 %v3801_v29, %v3101_v28  ;;  %v3893_v28 = vld [vmem:[#allocation11 + $0x28c] sm:$0xf] }
  0xd5   :  { %v985_v31 = vpop.f32.mrf.mxu3  ;;  %1283 = vmatpush.bf16.msra.mxu0 %v3102_v41 }
  0xd6   :  { %v3106_v31 = vor.u32 %v3800_v34, %v3103_v40  ;;  %v3406_v34 = vld [vmem:[#allocation11 + $0x200] sm:$0xf] }
  0xd7   :  { %v3884_v40 = vld [vmem:[#allocation11 + $0x23c] sm:$0xf0] }
  0xde   :  { %v996_v42 = vpop.f32.mrf.mxu0 }
  0xdf   :  { %v997_v38 = vadd.f32 %v996_v42, %v984_v39  ;;  %v1009_v43 = vpop.f32.mrf.mxu1  ;;  %v3114_v39 = vor.u32 %v3802_v33, %v3111_v37  ;;  %v3093_v42 = vld [vmem:[#allocation10 + $0x10] sm:$0xf]  ;;  %v3472_v33 = vld [vmem:[#allocation11 + $0x2c0] sm:$0xf0]  ;;  %v3901_v37 = vld [vmem:[#allocation11 + $0x2c4] sm:$0xf0] }
  0xe0   :  { %v3479_v29 = vor.u32 %v3901_v37, %v3478_v36  ;;  %v3216_v36 = vld [vmem:[#allocation11 + $0xc0] sm:$0xf0]  ;;  %v3222_v37 = vld [vmem:[#allocation11 + $0x88] sm:$0xf] }
  0xe1   :  { %v1010_v25 = vadd.f32 %v1009_v43, %v997_v38  ;;  %1295 = vmatpush.bf16.msra.mxu1 %v3114_v39  ;;  %v3799_v38 = vld [vmem:[#allocation10 + $0x14] sm:$0xf0]  ;;  %v3480_v39 = vld [vmem:[#allocation11 + $0x2c8] sm:$0xf0] }
  0xe2   :  { %v3483_v41 = vor.u32 %v3893_v28, %v3480_v39  ;;  %v3837_v28 = vld [vmem:[#allocation11 + $0xc4] sm:$0xf0] }
  0xe3   :  { %v3223_v39 = vor.u32 %v3837_v28, %v3222_v37  ;;  %v3879_v37 = vld [vmem:[#allocation11 + $0x21c] sm:$0xf] }
  0xe4   :  { %v3432_v28 = vld [vmem:[#allocation11 + $0x258] sm:$0xf0] }
  0xe5   :  { %1296 = vmatpush.bf16.msra.mxu1 %v3106_v31  ;;  %v3876_v31 = vld [vmem:[#allocation11 + $0x204] sm:$0xf] }
  0xe6   :  { %v1022_v44 = vpop.f32.mrf.mxu2  ;;  %v998_v47 = vpop.f32.mrf.mxu0 }
  0xe7   :  { %v1023_v32 = vadd.f32 %v1022_v44, %v1010_v25  ;;  %v1035_v45 = vpop.f32.mrf.mxu3  ;;  %v1011_v48 = vpop.f32.mrf.mxu1  ;;  %v3798_v25 = vld [vmem:[#allocation10 + $0x14] sm:$0xf]  ;;  %v3095_v44 = vld [vmem:[#allocation10 + $0x18] sm:$0xf0] }
  0xe9   :  { %v4329_v46 = vadd.f32 %v1035_v45, %v1023_v32 }
  0xee   :  { %v1024_v49 = vpop.f32.mrf.mxu2 }
  0xef   :  { %v1037_v50 = vpop.f32.mrf.mxu3  ;;  %v3094_v49 = vor.u32 %v3799_v38, %v3093_v42  ;;  %v3408_v42 = vld [vmem:[#allocation11 + $0x240] sm:$0xf0]  ;;  %v3414_v38 = vld [vmem:[#allocation11 + $0x208] sm:$0xf] }
  0xf1   :  { %1284 = vmatpush.bf16.msra.mxu0 %v3094_v49 }
  0xfe   :  { %v1048_v51 = vpop.f32.mrf.mxu0 }
  0xff   :  { %v1061_v52 = vpop.f32.mrf.mxu1  ;;  %v1049_v2 = vadd.f32 %v1048_v51, %v274_v57  ;;  %v3098_v51 = vor.u32 %v3798_v25, %v3095_v44  ;;  %v3407_v25 = vor.u32 %v3884_v40, %v3406_v34  ;;  %v3885_v44 = vld [vmem:[#allocation11 + $0x244] sm:$0xf0]  ;;  %v3829_v34 = vld [vmem:[#allocation11 + $0x8c] sm:$0xf] }
 0x100   :  { %v3415_v49 = vor.u32 %v3885_v44, %v3414_v38  ;;  %v3224_v40 = vld [vmem:[#allocation11 + $0xc8] sm:$0xf0]  ;;  %v3812_v38 = vld [vmem:[#allocation11 + $0x4] sm:$0xf]  ;;  %v3158_v44 = vld [vmem:[#allocation11 + $0x8] sm:$0xf] }
 0x101   :  { %v1062_v9 = vadd.f32 %v1061_v52, %v1049_v2  ;;  %v3085_v52 = vld [vmem:[#allocation10] sm:$0xf]  ;;  %1297 = vmatpush.bf16.msra.mxu1 %v3098_v51  ;;  %v3600_v2 = vld [vmem:[#allocation11 + $0x3c0] sm:$0xf0] }
 0x102   :  { %v3603_v6 = vor.u32 %v3924_v0, %v3600_v2  ;;  %v3868_v51 = vld [vmem:[#allocation11 + $0x1bc] sm:$0xf0] }
 0x104   :  { %2152 = vmatpush.bf16.msra.mxu3 %v3603_v6 }
 0x106   :  { %v1074_v53 = vpop.f32.mrf.mxu2  ;;  %v1050_v55 = vpop.f32.mrf.mxu0 }
 0x107   :  { %v1087_v54 = vpop.f32.mrf.mxu3  ;;  %v1063_v56 = vpop.f32.mrf.mxu1  ;;  %v1075_v16 = vadd.f32 %v1074_v53, %v1062_v9  ;;  %v3797_v53 = vld [vmem:[#allocation10 + $0x4] sm:$0xf0]  ;;  %v3796_v55 = vld [vmem:[#allocation10 + $0x4] sm:$0xf]  ;;  %v3608_v9 = vld [vmem:[#allocation11 + $0x3c8] sm:$0xf0] }
 0x108   :  { %v3087_v56 = vld [vmem:[#allocation10 + $0x8] sm:$0xf0]  ;;  %v3611_v12 = vor.u32 %v3925_v8, %v3608_v9 }
 0x109   :  { %v1088_v23 = vadd.f32 %v1087_v54, %v1075_v16  ;;  %v3090_v59 = vor.u32 %v3796_v55, %v3087_v56  ;;  %v3536_v16 = vld [vmem:[#allocation11 + $0x340] sm:$0xf0]  ;;  %v3350_v55 = vld [vmem:[#allocation11 + $0x188] sm:$0xf] }
 0x10a   :  { %v3539_v20 = vor.u32 %v3908_v14, %v3536_v16  ;;  %v3844_v16 = vld [vmem:[#allocation11 + $0x104] sm:$0xf] }
 0x10b   :  { %1298 = vmatpush.bf16.msra.mxu1 %v3090_v59 }
 0x10c   :  { %2153 = vmatpush.bf16.msra.mxu3 %v3539_v20  ;;  %v3853_v20 = vld [vmem:[#allocation11 + $0x144] sm:$0xf0] }
 0x10e   :  { %v1076_v58 = vpop.f32.mrf.mxu2 }
 0x10f   :  { %v1089_v62 = vpop.f32.mrf.mxu3  ;;  %v3086_v58 = vor.u32 %v3797_v53, %v3085_v52  ;;  %2178 = vmatpush.bf16.msrb.mxu1 %v3611_v12  ;;  %v3860_v53 = vld [vmem:[#allocation11 + $0x184] sm:$0xf] }
 0x110   :  { %v3598_v62 = vld [vmem:[#allocation11 + $0x380] sm:$0xf] }
 0x111   :  { %1285 = vmatpush.bf16.msra.mxu0 %v3086_v58  ;;  %v3599_v1 = vor.u32 %v3932_v63, %v3598_v62  ;;  %v3861_v58 = vld [vmem:[#allocation11 + $0x18c] sm:$0xf] }
 0x112   :  { %v3352_v62 = vld [vmem:[#allocation11 + $0x1c8] sm:$0xf0] }
 0x113   :  { %2139 = vmatpush.bf16.msra.mxu2 %v3599_v1  ;;  %v3355_v2 = vor.u32 %v3861_v58, %v3352_v62  ;;  %v3935_v58 = vld [vmem:[#allocation11 + $0x3d4] sm:$0xf0]  ;;  %v3550_v62 = vld [vmem:[#allocation11 + $0x310] sm:$0xf] }
 0x115   :  { %2165 = vmatpush.bf16.msrb.mxu0 %v3607_v7  ;;  %v3952_v7 = vld [vmem:[%s4524_s3] ss:$0 sm:$0xff] }
 0x117   :  { %2140 = vmatpush.bf16.msra.mxu2 %v3535_v15  ;;  %v3278_v15 = vld [vmem:[#allocation11 + $0x100] sm:$0xf] }
 0x119   :  { %2166 = vmatpush.bf16.msrb.mxu0 %v3543_v21  ;;  %v3283_v21 = vor.u32 %v3844_v16, %v3280_v18  ;;  %v3903_v16 = vld [vmem:[#allocation11 + $0x2d4] sm:$0xf0] }
 0x11d   :  { %2167 = vmatpush.bf16.msrb.mxu0 %v3479_v29 }
 0x11e   :  { %v1100_v24 = vpop.f32.mrf.mxu0 }
 0x11f   :  { %v1113_v26 = vpop.f32.mrf.mxu1  ;;  %v1101_v35 = vadd.f32 %v1100_v24, %v1088_v23  ;;  %v3470_v23 = vld [vmem:[#allocation11 + $0x280] sm:$0xf] }
 0x120   :  { %v3900_v24 = vld [vmem:[#allocation11 + $0x2bc] sm:$0xf0] }
 0x121   :  { %v1114_v43 = vadd.f32 %v1113_v26, %v1101_v35  ;;  %v3547_v26 = vor.u32 %v3909_v19, %v3544_v22  ;;  %v3471_v27 = vor.u32 %v3900_v24, %v3470_v23  ;;  %v3475_v35 = vor.u32 %v3892_v30, %v3472_v33  ;;  %2168 = vmatpush.bf16.msrb.mxu0 %v3415_v49  ;;  %v3286_v19 = vld [vmem:[#allocation11 + $0x108] sm:$0xf]  ;;  %v3845_v23 = vld [vmem:[#allocation11 + $0x10c] sm:$0xf]  ;;  %v3836_v30 = vld [vmem:[#allocation11 + $0xbc] sm:$0xf0] }
 0x122   :  { %v3287_v22 = vor.u32 %v3853_v20, %v3286_v19  ;;  %v3288_v24 = vld [vmem:[#allocation11 + $0x148] sm:$0xf0]  ;;  %v3828_v33 = vld [vmem:[#allocation11 + $0x84] sm:$0xf]  ;;  %v3895_v19 = vld [vmem:[#allocation11 + $0x29c] sm:$0xf] }
 0x123   :  { %2179 = vmatpush.bf16.msrb.mxu1 %v3547_v26  ;;  %2141 = vmatpush.bf16.msra.mxu2 %v3471_v27  ;;  %v3291_v26 = vor.u32 %v3845_v23, %v3288_v24  ;;  %v3214_v27 = vld [vmem:[#allocation11 + $0x80] sm:$0xf]  ;;  %v3219_v29 = vor.u32 %v3828_v33, %v3216_v36  ;;  %v3160_v49 = vld [vmem:[#allocation11 + $0x48] sm:$0xf0]  ;;  %v3496_v20 = vld [vmem:[#allocation11 + $0x2d8] sm:$0xf0] }
 0x124   :  { %2154 = vmatpush.bf16.msra.mxu3 %v3475_v35  ;;  %v3215_v35 = vor.u32 %v3836_v30, %v3214_v27  ;;  %v3886_v23 = vld [vmem:[#allocation11 + $0x24c] sm:$0xf0]  ;;  %v3878_v24 = vld [vmem:[#allocation11 + $0x214] sm:$0xf]  ;;  %v3430_v30 = vld [vmem:[#allocation11 + $0x218] sm:$0xf] }
 0x125   :  { %v3424_v27 = vld [vmem:[#allocation11 + $0x250] sm:$0xf0]  ;;  %v3887_v33 = vld [vmem:[#allocation11 + $0x254] sm:$0xf0] }
 0x126   :  { %v1126_v32 = vpop.f32.mrf.mxu2  ;;  %v1102_v48 = vpop.f32.mrf.mxu0  ;;  %v3431_v36 = vor.u32 %v3887_v33, %v3430_v30 }
 0x127   :  { %v1127_v45 = vadd.f32 %v1126_v32, %v1114_v43  ;;  %v1139_v47 = vpop.f32.mrf.mxu3  ;;  %v1115_v50 = vpop.f32.mrf.mxu1  ;;  %v3877_v32 = vld [vmem:[#allocation11 + $0x20c] sm:$0xf]  ;;  %v3411_v48 = vor.u32 %v3876_v31, %v3408_v42  ;;  %2180 = vmatpush.bf16.msrb.mxu1 %v3483_v41  ;;  %2142 = vmatpush.bf16.msra.mxu2 %v3407_v25  ;;  %v3227_v41 = vor.u32 %v3829_v34, %v3224_v40  ;;  %v3150_v31 = vld [vmem:[#allocation11] sm:$0xf]  ;;  %v3152_v25 = vld [vmem:[#allocation11 + $0x40] sm:$0xf0] }
 0x128   :  { %v3342_v50 = vld [vmem:[#allocation11 + $0x180] sm:$0xf]  ;;  %v3358_v34 = vld [vmem:[#allocation11 + $0x190] sm:$0xf] }
 0x129   :  { %v1140_v54 = vadd.f32 %v1139_v47, %v1127_v45  ;;  %v3416_v45 = vld [vmem:[#allocation11 + $0x248] sm:$0xf0]  ;;  %2155 = vmatpush.bf16.msra.mxu3 %v3411_v48  ;;  %v3820_v42 = vld [vmem:[#allocation11 + $0x3c] sm:$0xf0]  ;;  %v3870_v40 = vld [vmem:[#allocation11 + $0x1cc] sm:$0xf0] }
 0x12a   :  { %v3419_v52 = vor.u32 %v3877_v32, %v3416_v45  ;;  %v3821_v32 = vld [vmem:[#allocation11 + $0x44] sm:$0xf0]  ;;  %v3155_v45 = vor.u32 %v3812_v38, %v3152_v25  ;;  %v3813_v48 = vld [vmem:[#allocation11 + $0xc] sm:$0xf]  ;;  %v3366_v38 = vld [vmem:[#allocation11 + $0x198] sm:$0xf] }
 0x12b   :  { %v3082_v57 = vmul.f32 -1.442695, %v1140_v54  ;;  %v3344_v54 = vld [vmem:[#allocation11 + $0x1c0] sm:$0xf0] }
 0x12c   :  { %v3347_v0 = vor.u32 %v3860_v53, %v3344_v54  ;;  %2181 = vmatpush.bf16.msrb.mxu1 %v3419_v52  ;;  %v3934_v52 = vld [vmem:[#allocation11 + $0x3cc] sm:$0xf0]  ;;  %v3926_v53 = vld [vmem:[#allocation11 + $0x394] sm:$0xf] }
 0x12d   :  { %3956 = vpow2.f32 %v3082_v57  ;;  %v3869_v57 = vld [vmem:[#allocation11 + $0x1c4] sm:$0xf0]  ;;  %v3616_v54 = vld [vmem:[#allocation11 + $0x3d0] sm:$0xf0] }
 0x12e   :  { %v1128_v60 = vpop.f32.mrf.mxu2  ;;  %v3351_v1 = vor.u32 %v3869_v57, %v3350_v55  ;;  %2156 = vmatpush.bf16.msra.mxu3 %v3347_v0  ;;  %v3622_v57 = vld [vmem:[#allocation11 + $0x398] sm:$0xf] }
 0x12f   :  { %v1141_v61 = vpop.f32.mrf.mxu3 }
 0x130   :  { %v3343_v61 = vor.u32 %v3868_v51, %v3342_v50  ;;  %2169 = vmatpush.bf16.msrb.mxu0 %v3351_v1  ;;  %2182 = vmatpush.bf16.msrb.mxu1 %v3355_v2  ;;  %v3614_v50 = vld [vmem:[#allocation11 + $0x390] sm:$0xf]  ;;  %v3163_v51 = vor.u32 %v3813_v48, %v3160_v49  ;;  %v3910_v2 = vld [vmem:[#allocation11 + $0x314] sm:$0xf] }
 0x131   :  { %v3615_v55 = vor.u32 %v3934_v52, %v3614_v50  ;;  %v3294_v49 = vld [vmem:[#allocation11 + $0x110] sm:$0xf] }
 0x132   :  { %2143 = vmatpush.bf16.msra.mxu2 %v3343_v61  ;;  %2157 = vmatpush.bf16.msra.mxu3 %v3283_v21  ;;  %v3624_v61 = vld [vmem:[#allocation11 + $0x3d8] sm:$0xf0]  ;;  %v3499_v21 = vor.u32 %v3895_v19, %v3496_v20  ;;  %v3854_v50 = vld [vmem:[#allocation11 + $0x14c] sm:$0xf0] }
 0x133   :  { %v3957_v5 = vpop.eup %3956  ;;  %v3295_v52 = vor.u32 %v3854_v50, %v3294_v49  ;;  %v3928_v49 = vld [vmem:[#allocation11 + $0x3a4] sm:$0xf] }
 0x134   :  { %v4331_v11 = vadd.f32 1.0, %v3957_v5  ;;  %v1143_v5 = vmax.f32 %v4329_v46, 0.0  ;;  %v3852_v46 = vld [vmem:[#allocation11 + $0x13c] sm:$0xf0]  ;;  %2170 = vmatpush.bf16.msrb.mxu0 %v3287_v22  ;;  %2183 = vmatpush.bf16.msrb.mxu1 %v3291_v26  ;;  %v3422_v22 = vld [vmem:[#allocation11 + $0x210] sm:$0xf] }
 0x135   :  { %v3279_v17 = vor.u32 %v3852_v46, %v3278_v15  ;;  %v3488_v15 = vld [vmem:[#allocation11 + $0x2d0] sm:$0xf0]  ;;  %v3494_v46 = vld [vmem:[#allocation11 + $0x298] sm:$0xf]  ;;  %v3423_v26 = vor.u32 %v3886_v23, %v3422_v22  ;;  %v3815_v23 = vld [vmem:[#allocation11 + $0x1c] sm:$0xf] }
 0x136   :  { %3958 = vrcp.f32 %v4331_v11  ;;  %v1157_v59 = vand.u32 2147483647, %v4331_v11  ;;  %v1159_v60 = vand.u32 2147483648, %v4331_v11  ;;  %vm1153_vm1 = vweird.f32 %v4331_v11  ;;  %2158 = vmatpush.bf16.msra.mxu3 %v3219_v29  ;;  %v4345_v29 = vld [vmem:[%s4527_s6] sm:$0x3] }
 0x137   :  { %2144 = vmatpush.bf16.msra.mxu2 %v3279_v17  ;;  %v3495_v18 = vor.u32 %v3903_v16, %v3494_v46  ;;  %v3168_v16 = vld [vmem:[#allocation11 + $0x50] sm:$0xf0]  ;;  %v3632_v50 = vld [vmem:[#allocation11 + $0x3e0] sm:$0xf0] }
 0x138   :  { %v1160_v4 = vor.u32 1.1754944e-38, %v1159_v60  ;;  %vm1158_vm3 = vcmp.eq.f32.partialorder %v1157_v59, 8.507059e+37  ;;  %2171 = vmatpush.bf16.msrb.mxu0 %v3223_v39  ;;  %2184 = vmatpush.bf16.msrb.mxu1 %v3227_v41  ;;  %v3927_v59 = vld [vmem:[#allocation11 + $0x39c] sm:$0xf]  ;;  %v3623_v60 = vor.u32 %v3935_v58, %v3622_v57  ;;  %v3435_v39 = vor.u32 %v3879_v37, %v3432_v28  ;;  %v3862_v41 = vld [vmem:[#allocation11 + $0x194] sm:$0xf] }
 0x139   :  { %v3627_v0 = vor.u32 %v3927_v59, %v3624_v61  ;;  %v3855_v58 = vld [vmem:[#allocation11 + $0x154] sm:$0xf0]  ;;  %v3847_v59 = vld [vmem:[#allocation11 + $0x11c] sm:$0xf] }
 0x13a   :  { %2159 = vmatpush.bf16.msra.mxu3 %v3155_v45  ;;  %v3368_v45 = vld [vmem:[#allocation11 + $0x1d8] sm:$0xf0] }
 0x13b   :  { %2145 = vmatpush.bf16.msra.mxu2 %v3215_v35  ;;  %v3427_v35 = vor.u32 %v3878_v24, %v3424_v27  ;;  %v3176_v24 = vld [vmem:[#allocation11 + $0x58] sm:$0xf0] }
 0x13c   :  { %v3959_v43 = vpop.eup %3958  ;;  %2185 = vmatpush.bf16.msrb.mxu1 %v3163_v51  ;;  %v3846_v51 = vld [vmem:[#allocation11 + $0x114] sm:$0xf] }
 0x13d   :  { %v1149_v47 = vmul.f32 %v3959_v43, %v4331_v11  ;;  %vm1154_vm0 = vweird.f32 %v3959_v43 }
 0x13e   :  { %vm1155_vm2 = vmor %vm1153_vm1, %vm1154_vm0 }
 0x13f   :  { %v1150_v56 = vsub.f32 1.0, %v1149_v47  ;;  %v3159_v47 = vor.u32 %v3821_v32, %v3158_v44  ;;  %v3863_v32 = vld [vmem:[#allocation11 + $0x19c] sm:$0xf] }
 0x140   :  { %v3371_v48 = vor.u32 %v3863_v32, %v3368_v45 }
 0x141   :  { %v1151_v63 = vmul.f32 %v3959_v43, %v1150_v56  ;;  %2172 = vmatpush.bf16.msrb.mxu0 %v3159_v47  ;;  %v3619_v56 = vor.u32 %v3926_v53, %v3616_v54  ;;  %v1195_v47 = vperm.slane %v4345_v29, 1  ;;  %v3296_v53 = vld [vmem:[#allocation11 + $0x150] sm:$0xf0]  ;;  %v3302_v54 = vld [vmem:[#allocation11 + $0x118] sm:$0xf] }
 0x142   :  { %v3299_v57 = vor.u32 %v3846_v51, %v3296_v53  ;;  %v3638_v51 = vld [vmem:[#allocation11 + $0x3a8] sm:$0xf] }
 0x143   :  { %v1152_v3 = vadd.f32 %v3959_v43, %v1151_v63  ;;  %v3918_v63 = vld [vmem:[#allocation11 + $0x34c] sm:$0xf0]  ;;  %2204 = vmatpush.bf16.msrb.mxu3 %v3619_v56 }
 0x144   :  { %v3551_v1 = vor.u32 %v3918_v63, %v3550_v62  ;;  %v3303_v62 = vor.u32 %v3855_v58, %v3302_v54  ;;  %v3929_v54 = vld [vmem:[#allocation11 + $0x3ac] sm:$0xf]  ;;  %v3635_v58 = vor.u32 %v3928_v49, %v3632_v50  ;;  %v3318_v49 = vld [vmem:[#allocation11 + $0x128] sm:$0xf] }
 0x145   :  { %v1156_v6 = vsel %vm1155_vm2, %v3959_v43, %v1152_v3  ;;  %v3151_v43 = vor.u32 %v3820_v42, %v3150_v31  ;;  %v3552_v3 = vld [vmem:[#allocation11 + $0x350] sm:$0xf0]  ;;  %v3359_v31 = vor.u32 %v3870_v40, %v3358_v34  ;;  %v3857_v50 = vld [vmem:[#allocation11 + $0x164] sm:$0xf0] }
 0x146   :  { %v1161_v8 = vsel %vm1158_vm3, %v1160_v4, %v1156_v6  ;;  %v3558_v4 = vld [vmem:[#allocation11 + $0x318] sm:$0xf]  ;;  %v3360_v42 = vld [vmem:[#allocation11 + $0x1d0] sm:$0xf0] }
 0x147   :  { %v1163_v9 = vmul.f32 %v1161_v8, %v1143_v5  ;;  %2146 = vmatpush.bf16.msra.mxu2 %v3151_v43  ;;  %v3555_v5 = vor.u32 %v3910_v2, %v3552_v3  ;;  %v3919_v6 = vld [vmem:[#allocation11 + $0x354] sm:$0xf0]  ;;  %v3560_v8 = vld [vmem:[#allocation11 + $0x358] sm:$0xf0]  ;;  %v3363_v25 = vor.u32 %v3862_v41, %v3360_v42  ;;  %v3830_v2 = vld [vmem:[#allocation11 + $0x94] sm:$0xf] }
 0x148   :  { %v3871_v43 = vld [vmem:[#allocation11 + $0x1d4] sm:$0xf0] }
 0x149   :  { %v1167_v12 = vmul.f32 %v3952_v7, %v1163_v9  ;;  %v3911_v7 = vld [vmem:[#allocation11 + $0x31c] sm:$0xf]  ;;  %v3559_v9 = vor.u32 %v3919_v6, %v3558_v4  ;;  %2205 = vmatpush.bf16.msrb.mxu3 %v3555_v5  ;;  %v3367_v44 = vor.u32 %v3871_v43, %v3366_v38  ;;  %v3232_v5 = vld [vmem:[#allocation11 + $0xd0] sm:$0xf0]  ;;  %v3954_v43 = vld [vmem:[%s4528_s7] ss:$0 sm:$0xff] }
 0x14a   :  { %v3235_v6 = vor.u32 %v3830_v2, %v3232_v5  ;;  %v3921_v2 = vld [vmem:[#allocation11 + $0x364] sm:$0xf0]  ;;  %s4209_s7 = smov [#allocation14]  }
 0x14b   :  { %v1171_v11 = vadd.f32 %v3953_v10, %v1167_v12  ;;  %2191 = vmatpush.bf16.msrb.mxu2 %v3615_v55  ;;  %v3563_v10 = vor.u32 %v3911_v7, %v3560_v8  ;;  %v3486_v12 = vld [vmem:[#allocation11 + $0x290] sm:$0xf]  ;;  %v3238_v7 = vld [vmem:[#allocation11 + $0x98] sm:$0xf] }
 0x14c   :  { %v3839_v8 = vld [vmem:[#allocation11 + $0xd4] sm:$0xf0] }
 0x14d   :  { %v1172_v13 = vmax.f32 %v1171_v11, 0.0  ;;  %v3902_v11 = vld [vmem:[#allocation11 + $0x2cc] sm:$0xf0] }
 0x14f   :  { %v1192_v14 = vpack.c.bf16 %v1172_v13, %v1172_v13  ;;  %v3894_v13 = vld [vmem:[#allocation11 + $0x294] sm:$0xf]  ;;  %2192 = vmatpush.bf16.msrb.mxu2 %v3551_v1  ;;  %v3838_v1 = vld [vmem:[#allocation11 + $0xcc] sm:$0xf0] }
 0x150   :  { %v3491_v17 = vor.u32 %v3894_v13, %v3488_v15  ;;  %v3166_v13 = vld [vmem:[#allocation11 + $0x10] sm:$0xf]  ;;  %v3814_v15 = vld [vmem:[#allocation11 + $0x14] sm:$0xf] }
 0x151   :  { %1286 = vmatmul.bf16.vlgmr.msra.gmra.mxu0 %v1192_v14  ;;  %1299 = vmatmul.bf16.vlgmr.msra.gmra.mxu1 %v1192_v14  ;;  %v3487_v14 = vor.u32 %v3902_v11, %v3486_v12  ;;  %v3240_v12 = vld [vmem:[#allocation11 + $0xd8] sm:$0xf0] }
 0x152   :  { %2217 = vmatpush.bf16.msra.mxu0 %v3623_v60  ;;  %2230 = vmatpush.bf16.msra.mxu1 %v3627_v0  ;;  %v3304_v60 = vld [vmem:[#allocation11 + $0x158] sm:$0xf0]  ;;  %v3230_v0 = vld [vmem:[#allocation11 + $0x90] sm:$0xf] }
 0x153   :  { %2193 = vmatpush.bf16.msrb.mxu2 %v3487_v14  ;;  %2206 = vmatpush.bf16.msrb.mxu3 %v3491_v17  ;;  %v3307_v63 = vor.u32 %v3847_v59, %v3304_v60  ;;  %v3231_v4 = vor.u32 %v3838_v1, %v3230_v0  ;;  %v3822_v14 = vld [vmem:[#allocation11 + $0x4c] sm:$0xf0]  ;;  %v3174_v17 = vld [vmem:[#allocation11 + $0x18] sm:$0xf]  ;;  %v3566_v59 = vld [vmem:[#allocation11 + $0x320] sm:$0xf] }
 0x154   :  { %v3167_v46 = vor.u32 %v3822_v14, %v3166_v13  ;;  %v3920_v60 = vld [vmem:[#allocation11 + $0x35c] sm:$0xf0]  ;;  %v3568_v0 = vld [vmem:[#allocation11 + $0x360] sm:$0xf0]  ;;  %v3574_v1 = vld [vmem:[#allocation11 + $0x328] sm:$0xf] }
 0x155   :  { %v3567_v5 = vor.u32 %v3920_v60, %v3566_v59  ;;  %v3510_v13 = vld [vmem:[#allocation11 + $0x2a8] sm:$0xf]  ;;  %v3832_v60 = vld [vmem:[#allocation11 + $0xa4] sm:$0xf] }
 0x156   :  { %2218 = vmatpush.bf16.msra.mxu0 %v3559_v9  ;;  %2231 = vmatpush.bf16.msra.mxu1 %v3563_v10  ;;  %v3831_v9 = vld [vmem:[#allocation11 + $0x9c] sm:$0xf]  ;;  %v3239_v10 = vor.u32 %v3839_v8, %v3238_v7  ;;  %v3502_v7 = vld [vmem:[#allocation11 + $0x2a0] sm:$0xf]  ;;  %v3905_v14 = vld [vmem:[#allocation11 + $0x2e4] sm:$0xf0] }
 0x157   :  { %2194 = vmatpush.bf16.msrb.mxu2 %v3423_v26  ;;  %2207 = vmatpush.bf16.msrb.mxu3 %v3427_v35  ;;  %v3243_v11 = vor.u32 %v3831_v9, %v3240_v12  ;;  %v3179_v26 = vor.u32 %v3815_v23, %v3176_v24  ;;  %v1194_v35 = vperm.slane %v4345_v29, 0  ;;  %v3904_v8 = vld [vmem:[#allocation11 + $0x2dc] sm:$0xf0]  ;;  %v3575_v9 = vor.u32 %v3921_v2, %v3574_v1  ;;  %v3896_v12 = vld [vmem:[#allocation11 + $0x2a4] sm:$0xf] }
 0x158   :  { %v3440_v23 = vld [vmem:[#allocation11 + $0x260] sm:$0xf0]  ;;  %v3446_v24 = vld [vmem:[#allocation11 + $0x228] sm:$0xf]  ;;  %v3256_v1 = vld [vmem:[#allocation11 + $0xe8] sm:$0xf0] }
 0x159   :  { %v3182_v2 = vld [vmem:[#allocation11 + $0x20] sm:$0xf] }
 0x15a   :  { %2219 = vmatpush.bf16.msra.mxu0 %v3495_v18  ;;  %2232 = vmatpush.bf16.msra.mxu1 %v3499_v21  ;;  %v3823_v18 = vld [vmem:[#allocation11 + $0x54] sm:$0xf0]  ;;  %v3171_v21 = vor.u32 %v3814_v15, %v3168_v16  ;;  %v3897_v15 = vld [vmem:[#allocation11 + $0x2ac] sm:$0xf]  ;;  %v3503_v16 = vor.u32 %v3904_v8, %v3502_v7  ;;  %v3184_v7 = vld [vmem:[#allocation11 + $0x60] sm:$0xf0] }
 0x15b   :  { %2195 = vmatpush.bf16.msrb.mxu2 %v3359_v31  ;;  %2208 = vmatpush.bf16.msrb.mxu3 %v3363_v25  ;;  %v3175_v22 = vor.u32 %v3823_v18, %v3174_v17  ;;  %v3438_v18 = vld [vmem:[#allocation11 + $0x220] sm:$0xf] }
 0x15e   :  { %2220 = vmatpush.bf16.msra.mxu0 %v3431_v36  ;;  %2233 = vmatpush.bf16.msra.mxu1 %v3435_v39 }
 0x15f   :  { %2196 = vmatpush.bf16.msrb.mxu2 %v3295_v52  ;;  %2209 = vmatpush.bf16.msrb.mxu3 %v3299_v57  ;;  %v3937_v52 = vld [vmem:[#allocation11 + $0x3e4] sm:$0xf0] }
 0x162   :  { %2221 = vmatpush.bf16.msra.mxu0 %v3367_v44  ;;  %2234 = vmatpush.bf16.msra.mxu1 %v3371_v48  ;;  %v3955_v44 = vld [vmem:[%s4529_s8] ss:$0 sm:$0xff]  ;;  %v3936_v48 = vld [vmem:[#allocation11 + $0x3dc] sm:$0xf0]  ;;  %s2555_s8 = sshll.u32 %s4209_s7, 4  ;;  %s2556_s8 = int_to_ptr.vmem [resolvable:$true] %s2555_s8 }
 0x163   :  { %2197 = vmatpush.bf16.msrb.mxu2 %v3231_v4  ;;  %2210 = vmatpush.bf16.msrb.mxu3 %v3235_v6  ;;  %v3576_v4 = vld [vmem:[#allocation11 + $0x368] sm:$0xf0] }
 0x166   :  { %2222 = vmatpush.bf16.msra.mxu0 %v3303_v62  ;;  %2235 = vmatpush.bf16.msra.mxu1 %v3307_v63  ;;  %v3912_v63 = vld [vmem:[#allocation11 + $0x324] sm:$0xf] }
 0x167   :  { %2198 = vmatpush.bf16.msrb.mxu2 %v3167_v46  ;;  %2211 = vmatpush.bf16.msrb.mxu3 %v3171_v21  ;;  %v3571_v6 = vor.u32 %v3912_v63, %v3568_v0  ;;  %v3512_v46 = vld [vmem:[#allocation11 + $0x2e8] sm:$0xf0]  ;;  %v3841_v63 = vld [vmem:[#allocation11 + $0xe4] sm:$0xf0] }
 0x168   :  { %v3515_v21 = vor.u32 %v3897_v15, %v3512_v46  ;;  %v3833_v0 = vld [vmem:[#allocation11 + $0xac] sm:$0xf]  ;;  %v3938_v15 = vld [vmem:[#allocation11 + $0x3ec] sm:$0xf0]  ;;  %v3930_v46 = vld [vmem:[#allocation11 + $0x3b4] sm:$0xf] }
 0x16a   :  { %2223 = vmatpush.bf16.msra.mxu0 %v3239_v10  ;;  %2236 = vmatpush.bf16.msra.mxu1 %v3243_v11  ;;  %v3504_v11 = vld [vmem:[#allocation11 + $0x2e0] sm:$0xf0] }
 0x16b   :  { %v3507_v17 = vor.u32 %v3896_v12, %v3504_v11  ;;  %v3825_v12 = vld [vmem:[#allocation11 + $0x64] sm:$0xf0]  ;;  %v3817_v11 = vld [vmem:[#allocation11 + $0x2c] sm:$0xf] }
 0x16e   :  { %2224 = vmatpush.bf16.msra.mxu0 %v3175_v22  ;;  %2237 = vmatpush.bf16.msra.mxu1 %v3179_v26  ;;  %v3880_v22 = vld [vmem:[#allocation11 + $0x224] sm:$0xf]  ;;  %v3889_v26 = vld [vmem:[#allocation11 + $0x264] sm:$0xf0] }
 0x1ce   :  { %v1287_v55 = vpop.f32.mrf.mxu0  ;;  %v1300_v56 = vpop.f32.mrf.mxu1 }
 0x1cf   :  { %v1301_v61 = vadd.f32 %v1300_v56, %v1195_v47  ;;  %v1288_v39 = vadd.f32 %v1287_v55, %v1194_v35  ;;  %v3630_v47 = vld [vmem:[#allocation11 + $0x3a0] sm:$0xf]  ;;  %v3640_v55 = vld [vmem:[#allocation11 + $0x3e8] sm:$0xf0]  ;;  %v3443_v35 = vor.u32 %v3880_v22, %v3440_v23  ;;  %v3656_v22 = vld [vmem:[#allocation11 + $0x3f8] sm:$0xf0] }
 0x1d0   :  { %v3631_v57 = vor.u32 %v3936_v48, %v3630_v47  ;;  %v3643_v62 = vor.u32 %v3929_v54, %v3640_v55  ;;  %v3848_v47 = vld [vmem:[#allocation11 + $0x124] sm:$0xf]  ;;  %v3246_v55 = vld [vmem:[#allocation11 + $0xa0] sm:$0xf] }
 0x1d1   :  { %v3147_v3 = vmul.f32 -1.442695, %v1301_v61  ;;  %v1304_v42 = vmax.f32 %v1288_v39, 0.0  ;;  %v3639_v61 = vor.u32 %v3937_v52, %v3638_v51  ;;  %v3312_v48 = vld [vmem:[#allocation11 + $0x160] sm:$0xf0] }
 0x1d2   :  { %v3849_v51 = vld [vmem:[#allocation11 + $0x12c] sm:$0xf]  ;;  %v3315_v54 = vor.u32 %v3848_v47, %v3312_v48  ;;  %v3907_v47 = vld [vmem:[#allocation11 + $0x2f4] sm:$0xf0]  ;;  %v3899_v48 = vld [vmem:[#allocation11 + $0x2bc] sm:$0xf] }
 0x1d3   :  { %3960 = vpow2.f32 %v3147_v3  ;;  %v3913_v3 = vld [vmem:[#allocation11 + $0x32c] sm:$0xf] }
 0x1d4   :  { %v3579_v10 = vor.u32 %v3913_v3, %v3576_v4  ;;  %v3320_v52 = vld [vmem:[#allocation11 + $0x168] sm:$0xf0] }
 0x1d5   :  { %v3323_v59 = vor.u32 %v3849_v51, %v3320_v52  ;;  %v3454_v52 = vld [vmem:[#allocation11 + $0x230] sm:$0xf] }
 0x1d6   :  { %v1289_v19 = vpop.f32.mrf.mxu0  ;;  %v1302_v20 = vpop.f32.mrf.mxu1 }
 0x1d7   :  { %v3888_v19 = vld [vmem:[#allocation11 + $0x25c] sm:$0xf0]  ;;  %v3511_v20 = vor.u32 %v3905_v14, %v3510_v13  ;;  %v3192_v13 = vld [vmem:[#allocation11 + $0x68] sm:$0xf0]  ;;  %v3646_v14 = vld [vmem:[#allocation11 + $0x3b0] sm:$0xf] }
 0x1d9   :  { %v3961_v27 = vpop.eup %3960 }
 0x1da   :  { %v1308_v30 = vadd.f32 1.0, %v3961_v27  ;;  %v3881_v27 = vld [vmem:[#allocation11 + $0x22c] sm:$0xf] }
 0x1dc   :  { %3962 = vrcp.f32 %v1308_v30  ;;  %v1320_v28 = vand.u32 2147483648, %v1308_v30  ;;  %v1318_v40 = vand.u32 2147483647, %v1308_v30  ;;  %vm1314_vm5 = vweird.f32 %v1308_v30 }
 0x1de   :  { %v1321_v31 = vor.u32 1.1754944e-38, %v1320_v28  ;;  %vm1319_vm7 = vcmp.eq.f32.partialorder %v1318_v40, 8.507059e+37  ;;  %v3447_v28 = vor.u32 %v3889_v26, %v3446_v24  ;;  %v3376_v40 = vld [vmem:[#allocation11 + $0x1e0] sm:$0xf0]  ;;  %v3195_v24 = vor.u32 %v3817_v11, %v3192_v13  ;;  %v3326_v13 = vld [vmem:[#allocation11 + $0x130] sm:$0xf] }
 0x1df   :  { %v3647_v26 = vor.u32 %v3938_v15, %v3646_v14  ;;  %v3858_v14 = vld [vmem:[#allocation11 + $0x16c] sm:$0xf0] }
 0x1e2   :  { %v3963_v33 = vpop.eup %3962 }
 0x1e3   :  { %v1310_v36 = vmul.f32 %v3963_v33, %v1308_v30  ;;  %vm1315_vm4 = vweird.f32 %v3963_v33  ;;  %v3448_v30 = vld [vmem:[#allocation11 + $0x268] sm:$0xf0] }
 0x1e4   :  { %vm1316_vm6 = vmor %vm1314_vm5, %vm1315_vm4  ;;  %v3451_v39 = vor.u32 %v3881_v27, %v3448_v30  ;;  %v3582_v30 = vld [vmem:[#allocation11 + $0x330] sm:$0xf] }
 0x1e5   :  { %v1311_v37 = vsub.f32 1.0, %v1310_v36  ;;  %v3374_v36 = vld [vmem:[#allocation11 + $0x1a0] sm:$0xf] }
 0x1e7   :  { %v1312_v34 = vmul.f32 %v3963_v33, %v1311_v37  ;;  %v3872_v37 = vld [vmem:[#allocation11 + $0x1dc] sm:$0xf0] }
 0x1e9   :  { %v1313_v41 = vadd.f32 %v3963_v33, %v1312_v34  ;;  %v3864_v34 = vld [vmem:[#allocation11 + $0x1a4] sm:$0xf] }
 0x1eb   :  { %v1317_v38 = vsel %vm1316_vm6, %v3963_v33, %v1313_v41  ;;  %v3439_v33 = vor.u32 %v3888_v19, %v3438_v18  ;;  %v3382_v41 = vld [vmem:[#allocation11 + $0x1a8] sm:$0xf] }
 0x1ec   :  { %v1322_v25 = vsel %vm1319_vm7, %v1321_v31, %v1317_v38  ;;  %v3873_v31 = vld [vmem:[#allocation11 + $0x1e4] sm:$0xf0]  ;;  %v3384_v38 = vld [vmem:[#allocation11 + $0x1e8] sm:$0xf0] }
 0x1ed   :  { %v1324_v29 = vmul.f32 %v1322_v25, %v1304_v42  ;;  %v3865_v42 = vld [vmem:[#allocation11 + $0x1ac] sm:$0xf]  ;;  %v3379_v25 = vor.u32 %v3864_v34, %v3376_v40  ;;  %v3923_v34 = vld [vmem:[#allocation11 + $0x374] sm:$0xf0]  ;;  %v3915_v40 = vld [vmem:[#allocation11 + $0x33c] sm:$0xf] }
 0x1ef   :  { %v1328_v32 = vmul.f32 %v3954_v43, %v1324_v29  ;;  %v3375_v43 = vor.u32 %v3872_v37, %v3374_v36  ;;  %v3310_v29 = vld [vmem:[#allocation11 + $0x120] sm:$0xf]  ;;  %v3914_v37 = vld [vmem:[#allocation11 + $0x334] sm:$0xf] }
 0x1f1   :  { %v1332_v45 = vadd.f32 %v3955_v44, %v1328_v32  ;;  %v3856_v44 = vld [vmem:[#allocation11 + $0x15c] sm:$0xf0]  ;;  %v3383_v32 = vor.u32 %v3873_v31, %v3382_v41  ;;  %v3592_v41 = vld [vmem:[#allocation11 + $0x378] sm:$0xf0] }
 0x1f3   :  { %v1333_v53 = vmax.f32 %v1332_v45, 0.0  ;;  %v3387_v45 = vor.u32 %v3865_v42, %v3384_v38  ;;  %v3518_v38 = vld [vmem:[#allocation11 + $0x2b0] sm:$0xf] }
 0x1f5   :  { %v4355_v56 = vpack.c.bf16 %v1333_v53, %v1333_v53  ;;  %v3311_v53 = vor.u32 %v3856_v44, %v3310_v29  ;;  %v3595_v29 = vor.u32 %v3915_v40, %v3592_v41  ;;  %v3898_v44 = vld [vmem:[#allocation11 + $0x2b4] sm:$0xf]  ;;  %v3198_v41 = vld [vmem:[#allocation11 + $0x30] sm:$0xf] }
 0x1f7   :  { %2147 = vmatmul.bf16.vlgmr.msra.gmra.mxu2 %v4355_v56  ;;  %2160 = vmatmul.bf16.vlgmr.msra.gmra.mxu3 %v4355_v56 }
 0x1f8   :  { %2173 = vmatmul.bf16.vlgmr.msrb.gmra.mxu0 %v4355_v56  ;;  %2186 = vmatmul.bf16.vlgmr.msrb.gmra.mxu1 %v4355_v56 }
 0x1f9   :  { %2243 = vmatpush.bf16.msra.mxu2 %v3631_v57  ;;  %2256 = vmatpush.bf16.msra.mxu3 %v3635_v58  ;;  %v3840_v57 = vld [vmem:[#allocation11 + $0xdc] sm:$0xf0]  ;;  %v3319_v58 = vor.u32 %v3857_v50, %v3318_v49  ;;  %v3528_v49 = vld [vmem:[#allocation11 + $0x2f8] sm:$0xf0] }
 0x1fa   :  { %2269 = vmatpush.bf16.msrb.mxu0 %v3639_v61  ;;  %2282 = vmatpush.bf16.msrb.mxu1 %v3643_v62  ;;  %v3248_v61 = vld [vmem:[#allocation11 + $0xe0] sm:$0xf0]  ;;  %v3254_v62 = vld [vmem:[#allocation11 + $0xa8] sm:$0xf]  ;;  %v3247_v3 = vor.u32 %v3840_v57, %v3246_v55  ;;  %v3531_v55 = vor.u32 %v3899_v48, %v3528_v49  ;;  %v3882_v57 = vld [vmem:[#allocation11 + $0x234] sm:$0xf] }
 0x1fb   :  { %v3251_v4 = vor.u32 %v3832_v60, %v3248_v61  ;;  %v3255_v8 = vor.u32 %v3841_v63, %v3254_v62  ;;  %v3891_v60 = vld [vmem:[#allocation11 + $0x274] sm:$0xf0]  ;;  %v3883_v61 = vld [vmem:[#allocation11 + $0x23c] sm:$0xf] }
 0x1fc   :  { %v3464_v62 = vld [vmem:[#allocation11 + $0x278] sm:$0xf0] }
 0x1fd   :  { %2244 = vmatpush.bf16.msra.mxu2 %v3567_v5  ;;  %2257 = vmatpush.bf16.msra.mxu3 %v3571_v6  ;;  %v3824_v5 = vld [vmem:[#allocation11 + $0x5c] sm:$0xf0]  ;;  %v3816_v6 = vld [vmem:[#allocation11 + $0x24] sm:$0xf] }
 0x1fe   :  { %2270 = vmatpush.bf16.msrb.mxu0 %v3575_v9  ;;  %2283 = vmatpush.bf16.msrb.mxu1 %v3579_v10  ;;  %v3259_v9 = vor.u32 %v3833_v0, %v3256_v1  ;;  %v3190_v10 = vld [vmem:[#allocation11 + $0x28] sm:$0xf]  ;;  %v3183_v18 = vor.u32 %v3824_v5, %v3182_v2  ;;  %v3187_v19 = vor.u32 %v3816_v6, %v3184_v7  ;;  %v3390_v1 = vld [vmem:[#allocation11 + $0x1b0] sm:$0xf]  ;;  %v3866_v5 = vld [vmem:[#allocation11 + $0x1b4] sm:$0xf] }
 0x1ff   :  { %v3191_v23 = vor.u32 %v3825_v12, %v3190_v10  ;;  %v3874_v2 = vld [vmem:[#allocation11 + $0x1ec] sm:$0xf0]  ;;  %v3392_v6 = vld [vmem:[#allocation11 + $0x1f0] sm:$0xf0]  ;;  %v3398_v7 = vld [vmem:[#allocation11 + $0x1b8] sm:$0xf] }
 0x200   :  { %v3400_v10 = vld [vmem:[#allocation11 + $0x1f8] sm:$0xf0]  ;;  %v3391_v12 = vor.u32 %v3874_v2, %v3390_v1  ;;  %v3395_v11 = vor.u32 %v3866_v5, %v3392_v6  ;;  %v4381_v2 = vld [vmem:[#allocation13 + $0x8] sm:$0xff] }
 0x201   :  { %2245 = vmatpush.bf16.msra.mxu2 %v3503_v16  ;;  %2258 = vmatpush.bf16.msra.mxu3 %v3507_v17  ;;  %v3648_v16 = vld [vmem:[#allocation11 + $0x3f0] sm:$0xf0]  ;;  %v3654_v17 = vld [vmem:[#allocation11 + $0x3b8] sm:$0xf]  ;;  %v1478_v5 = vperm.slane %v4381_v2, 3 }
 0x202   :  { %2271 = vmatpush.bf16.msrb.mxu0 %v3511_v20  ;;  %2284 = vmatpush.bf16.msrb.mxu1 %v3515_v21  ;;  %v3939_v20 = vld [vmem:[#allocation11 + $0x3f4] sm:$0xf0]  ;;  %v3931_v21 = vld [vmem:[#allocation11 + $0x3bc] sm:$0xf]  ;;  %v3651_v27 = vor.u32 %v3930_v46, %v3648_v16  ;;  %v3850_v16 = vld [vmem:[#allocation11 + $0x134] sm:$0xf] }
 0x203   :  { %v3659_v36 = vor.u32 %v3931_v21, %v3656_v22  ;;  %v3336_v21 = vld [vmem:[#allocation11 + $0x178] sm:$0xf0]  ;;  %v3327_v22 = vor.u32 %v3858_v14, %v3326_v13 }
 0x205   :  { %2246 = vmatpush.bf16.msra.mxu2 %v3439_v33  ;;  %2259 = vmatpush.bf16.msra.mxu3 %v3443_v35  ;;  %v3922_v33 = vld [vmem:[#allocation11 + $0x36c] sm:$0xf0]  ;;  %v3655_v35 = vor.u32 %v3939_v20, %v3654_v17  ;;  %v3328_v17 = vld [vmem:[#allocation11 + $0x170] sm:$0xf0]  ;;  %v3851_v20 = vld [vmem:[#allocation11 + $0x13c] sm:$0xf] }
 0x206   :  { %2272 = vmatpush.bf16.msrb.mxu0 %v3447_v28  ;;  %2285 = vmatpush.bf16.msrb.mxu1 %v3451_v39  ;;  %v3584_v28 = vld [vmem:[#allocation11 + $0x370] sm:$0xf0]  ;;  %v3590_v39 = vld [vmem:[#allocation11 + $0x338] sm:$0xf]  ;;  %v3583_v31 = vor.u32 %v3922_v33, %v3582_v30  ;;  %v3339_v30 = vor.u32 %v3851_v20, %v3336_v21 }
 0x207   :  { %2199 = vmatmul.bf16.vlgmr.msrb.gmra.mxu2 %v4355_v56  ;;  %2212 = vmatmul.bf16.vlgmr.msrb.gmra.mxu3 %v4355_v56  ;;  %v3587_v42 = vor.u32 %v3914_v37, %v3584_v28  ;;  %v3834_v33 = vld [vmem:[#allocation11 + $0xb4] sm:$0xf]  ;;  %v3843_v37 = vld [vmem:[#allocation11 + $0xf4] sm:$0xf0]  ;;  %v3835_v28 = vld [vmem:[#allocation11 + $0xbc] sm:$0xf] }
 0x208   :  { %2225 = vmatmul.bf16.vlgmr.msra.gmra.mxu0 %v4355_v56  ;;  %2238 = vmatmul.bf16.vlgmr.msra.gmra.mxu1 %v4355_v56 }
 0x209   :  { %2247 = vmatpush.bf16.msra.mxu2 %v3375_v43  ;;  %2260 = vmatpush.bf16.msra.mxu3 %v3379_v25  ;;  %v3906_v43 = vld [vmem:[#allocation11 + $0x2ec] sm:$0xf0]  ;;  %v3591_v25 = vor.u32 %v3923_v34, %v3590_v39  ;;  %v3272_v39 = vld [vmem:[#allocation11 + $0xf8] sm:$0xf0] }
 0x20a   :  { %2273 = vmatpush.bf16.msrb.mxu0 %v3383_v32  ;;  %2286 = vmatpush.bf16.msrb.mxu1 %v3387_v45  ;;  %v3520_v32 = vld [vmem:[#allocation11 + $0x2f0] sm:$0xf0]  ;;  %v3526_v45 = vld [vmem:[#allocation11 + $0x2b8] sm:$0xf]  ;;  %v3519_v50 = vor.u32 %v3906_v43, %v3518_v38  ;;  %v3275_v38 = vor.u32 %v3835_v28, %v3272_v39 }
 0x20b   :  { %v3523_v51 = vor.u32 %v3898_v44, %v3520_v32  ;;  %v3818_v43 = vld [vmem:[#allocation11 + $0x34] sm:$0xf]  ;;  %v3827_v44 = vld [vmem:[#allocation11 + $0x74] sm:$0xf0]  ;;  %v3819_v32 = vld [vmem:[#allocation11 + $0x3c] sm:$0xf] }
 0x20d   :  { %2248 = vmatpush.bf16.msra.mxu2 %v3311_v53  ;;  %2261 = vmatpush.bf16.msra.mxu3 %v3315_v54  ;;  %v3890_v53 = vld [vmem:[#allocation11 + $0x26c] sm:$0xf0]  ;;  %v3527_v54 = vor.u32 %v3907_v47, %v3526_v45  ;;  %v3208_v45 = vld [vmem:[#allocation11 + $0x78] sm:$0xf0] }
 0x20e   :  { %2274 = vmatpush.bf16.msrb.mxu0 %v3319_v58  ;;  %2287 = vmatpush.bf16.msrb.mxu1 %v3323_v59  ;;  %v3456_v58 = vld [vmem:[#allocation11 + $0x270] sm:$0xf0]  ;;  %v3462_v59 = vld [vmem:[#allocation11 + $0x238] sm:$0xf]  ;;  %v3455_v63 = vor.u32 %v3890_v53, %v3454_v52 }
 0x20f   :  { %v3459_v0 = vor.u32 %v3882_v57, %v3456_v58 }
 0x211   :  { %2249 = vmatpush.bf16.msra.mxu2 %v3247_v3  ;;  %2262 = vmatpush.bf16.msra.mxu3 %v3251_v4  ;;  %v3463_v3 = vor.u32 %v3891_v60, %v3462_v59  ;;  %v3467_v4 = vor.u32 %v3883_v61, %v3464_v62 }
 0x212   :  { %2275 = vmatpush.bf16.msrb.mxu0 %v3255_v8  ;;  %2288 = vmatpush.bf16.msrb.mxu1 %v3259_v9  ;;  %v3875_v8 = vld [vmem:[#allocation11 + $0x1f4] sm:$0xf0]  ;;  %v3867_v9 = vld [vmem:[#allocation11 + $0x1bc] sm:$0xf] }
 0x213   :  { %v3399_v15 = vor.u32 %v3875_v8, %v3398_v7  ;;  %v3403_v46 = vor.u32 %v3867_v9, %v3400_v10  ;;  %v1475_v10 = vperm.slane %v4381_v2, 0 }
 0x215   :  { %2250 = vmatpush.bf16.msra.mxu2 %v3183_v18  ;;  %2263 = vmatpush.bf16.msra.mxu3 %v3187_v19  ;;  %v3334_v18 = vld [vmem:[#allocation11 + $0x138] sm:$0xf] }
 0x216   :  { %2276 = vmatpush.bf16.msrb.mxu0 %v3191_v23  ;;  %2289 = vmatpush.bf16.msrb.mxu1 %v3195_v24  ;;  %v3859_v19 = vld [vmem:[#allocation11 + $0x174] sm:$0xf0]  ;;  %v3331_v23 = vor.u32 %v3850_v16, %v3328_v17  ;;  %v3262_v24 = vld [vmem:[#allocation11 + $0xb0] sm:$0xf]  ;;  %v4387_v17 = vld [vmem:[#allocation13] sm:$0xff] }
 0x218   :  { %2251 = vmatmul.bf16.vlgmr.msra.gmra.mxu2 %v4355_v56  ;;  %2264 = vmatmul.bf16.vlgmr.msra.gmra.mxu3 %v4355_v56 }
 0x219   :  { %2295 = vmatpush.bf16.msrb.mxu2 %v3647_v26  ;;  %2308 = vmatpush.bf16.msrb.mxu3 %v3651_v27  ;;  %v3842_v26 = vld [vmem:[#allocation11 + $0xec] sm:$0xf0]  ;;  %v3335_v27 = vor.u32 %v3859_v19, %v3334_v18 }
 0x21a   :  { %2321 = vmatpush.bf16.msra.mxu0 %v3655_v35  ;;  %2334 = vmatpush.bf16.msra.mxu1 %v3659_v36  ;;  %v3264_v35 = vld [vmem:[#allocation11 + $0xf0] sm:$0xf0]  ;;  %v3270_v36 = vld [vmem:[#allocation11 + $0xb8] sm:$0xf]  ;;  %v3263_v34 = vor.u32 %v3842_v26, %v3262_v24  ;;  %v1470_v26 = vperm.slane %v4387_v17, 3 }
 0x21b   :  { %2277 = vmatmul.bf16.vlgmr.msrb.gmra.mxu0 %v4355_v56  ;;  %2290 = vmatmul.bf16.vlgmr.msrb.gmra.mxu1 %v4355_v56  ;;  %v3267_v40 = vor.u32 %v3834_v33, %v3264_v35 }
 0x21d   :  { %2296 = vmatpush.bf16.msrb.mxu2 %v3583_v31  ;;  %2309 = vmatpush.bf16.msrb.mxu3 %v3587_v42  ;;  %v3826_v31 = vld [vmem:[#allocation11 + $0x6c] sm:$0xf0]  ;;  %v3271_v42 = vor.u32 %v3843_v37, %v3270_v36  ;;  %v1468_v37 = vperm.slane %v4387_v17, 1 }
 0x21e   :  { %2322 = vmatpush.bf16.msra.mxu0 %v3591_v25  ;;  %2335 = vmatpush.bf16.msra.mxu1 %v3595_v29  ;;  %v3200_v25 = vld [vmem:[#allocation11 + $0x70] sm:$0xf0]  ;;  %v3206_v29 = vld [vmem:[#allocation11 + $0x38] sm:$0xf]  ;;  %v3199_v47 = vor.u32 %v3826_v31, %v3198_v41 }
 0x21f   :  { %v3203_v48 = vor.u32 %v3818_v43, %v3200_v25  ;;  %v3207_v49 = vor.u32 %v3827_v44, %v3206_v29 }
 0x221   :  { %2297 = vmatpush.bf16.msrb.mxu2 %v3519_v50  ;;  %2310 = vmatpush.bf16.msrb.mxu3 %v3523_v51  ;;  %v3211_v50 = vor.u32 %v3819_v32, %v3208_v45 }
 0x222   :  { %2323 = vmatpush.bf16.msra.mxu0 %v3527_v54  ;;  %2336 = vmatpush.bf16.msra.mxu1 %v3531_v55 }
 0x225   :  { %2298 = vmatpush.bf16.msrb.mxu2 %v3455_v63  ;;  %2311 = vmatpush.bf16.msrb.mxu3 %v3459_v0 }
 0x226   :  { %2324 = vmatpush.bf16.msra.mxu0 %v3463_v3  ;;  %2337 = vmatpush.bf16.msra.mxu1 %v3467_v4  ;;  %v1477_v4 = vperm.slane %v4381_v2, 2 }
 0x229   :  { %2299 = vmatpush.bf16.msrb.mxu2 %v3391_v12  ;;  %2312 = vmatpush.bf16.msrb.mxu3 %v3395_v11  ;;  %v1476_v12 = vperm.slane %v4381_v2, 1 }
 0x22a   :  { %2325 = vmatpush.bf16.msra.mxu0 %v3399_v15  ;;  %2338 = vmatpush.bf16.msra.mxu1 %v3403_v46 }
 0x22d   :  { %2300 = vmatpush.bf16.msrb.mxu2 %v3327_v22  ;;  %2313 = vmatpush.bf16.msrb.mxu3 %v3331_v23  ;;  %v1469_v23 = vperm.slane %v4387_v17, 2 }
 0x22e   :  { %2326 = vmatpush.bf16.msra.mxu0 %v3335_v27  ;;  %2339 = vmatpush.bf16.msra.mxu1 %v3339_v30  ;;  %v1467_v30 = vperm.slane %v4387_v17, 0 }
 0x231   :  { %2301 = vmatpush.bf16.msrb.mxu2 %v3263_v34  ;;  %2314 = vmatpush.bf16.msrb.mxu3 %v3267_v40 }
 0x232   :  { %2327 = vmatpush.bf16.msra.mxu0 %v3271_v42  ;;  %2340 = vmatpush.bf16.msra.mxu1 %v3275_v38 }
 0x235   :  { %2302 = vmatpush.bf16.msrb.mxu2 %v3199_v47  ;;  %2315 = vmatpush.bf16.msrb.mxu3 %v3203_v48 }
 0x236   :  { %2328 = vmatpush.bf16.msra.mxu0 %v3207_v49  ;;  %2341 = vmatpush.bf16.msra.mxu1 %v3211_v50 }
 0x238   :  { %2303 = vmatmul.bf16.vlgmr.msrb.gmra.mxu2 %v4355_v56  ;;  %2316 = vmatmul.bf16.vlgmr.msrb.gmra.mxu3 %v4355_v56 }
 0x239   :  { %2329 = vmatmul.bf16.vlgmr.msra.gmra.mxu0 %v4355_v56  ;;  %2342 = vmatmul.bf16.vlgmr.msra.gmra.mxu1 %v4355_v56 }
 0x275   :  { %v2174_v51 = vpop.f32.mrf.mxu0  ;;  %v2187_v52 = vpop.f32.mrf.mxu1 }
 0x276   :  { %v4395_v28 = vadd.f32 %v2174_v51, %v1469_v23  ;;  %v4398_v34 = vadd.f32 %v2187_v52, %v1470_v26 }
 0x278   :  { %v2349_v43 = vmax.f32 %v4395_v28, 0.0  ;;  %v2350_v29 = vmax.f32 %v4398_v34, 0.0 }
 0x27a   :  { %v2148_v53 = vpop.f32.mrf.mxu2  ;;  %v2161_v54 = vpop.f32.mrf.mxu3 }
 0x27b   :  { %v4400_v41 = vadd.f32 %v2148_v53, %v1467_v30  ;;  %v4404_v42 = vadd.f32 %v2161_v54, %v1468_v37  ;;  %v1481_v53 = vperm.slane %v4381_v2, 6  ;;  %v1482_v54 = vperm.slane %v4381_v2, 7 }
 0x27d   :  { %v2176_v55 = vpop.f32.mrf.mxu0  ;;  %v2189_v57 = vpop.f32.mrf.mxu1  ;;  %v2347_v47 = vmax.f32 %v4400_v41, 0.0  ;;  %v2348_v51 = vmax.f32 %v4404_v42, 0.0  ;;  %v1473_v42 = vperm.slane %v4387_v17, 6  ;;  %v1474_v41 = vperm.slane %v4387_v17, 7 }
 0x27e   :  { %v1479_v57 = vperm.slane %v4381_v2, 4 }
 0x282   :  { %v2150_v58 = vpop.f32.mrf.mxu2  ;;  %v2163_v59 = vpop.f32.mrf.mxu3 }
 0x283   :  { %v1480_v58 = vperm.slane %v4381_v2, 5 }
 0x285   :  { %v4373_v60 = vpop.f32.mrf.mxu0  ;;  %v4375_v61 = vpop.f32.mrf.mxu1 }
 0x28a   :  { %v4377_v62 = vpop.f32.mrf.mxu2  ;;  %v4379_v63 = vpop.f32.mrf.mxu3 }
 0x28d   :  { %v2228_v0 = vpop.f32.mrf.mxu0  ;;  %v2241_v1 = vpop.f32.mrf.mxu1 }
 0x292   :  { %v2202_v56 = vpop.f32.mrf.mxu2  ;;  %v2215_v3 = vpop.f32.mrf.mxu3 }
 0x298   :  { %v2278_v6 = vpop.f32.mrf.mxu0  ;;  %v2291_v7 = vpop.f32.mrf.mxu1 }
 0x299   :  { %v2279_v8 = vadd.f32 %v2278_v6, %v1477_v4  ;;  %v2292_v9 = vadd.f32 %v2291_v7, %v1478_v5 }
 0x29b   :  { %v3662_v11 = vmul.f32 -1.442695, %v2279_v8  ;;  %v3663_v13 = vmul.f32 -1.442695, %v2292_v9  ;;  %v2252_v14 = vpop.f32.mrf.mxu2  ;;  %v2265_v15 = vpop.f32.mrf.mxu3 }
 0x29c   :  { %v2253_v46 = vadd.f32 %v2252_v14, %v1475_v10  ;;  %v2266_v16 = vadd.f32 %v2265_v15, %v1476_v12 }
 0x29d   :  { %3964 = vpow2.f32 %v3662_v11 }
 0x29e   :  { %3966 = vpow2.f32 %v3663_v13  ;;  %v3660_v18 = vmul.f32 -1.442695, %v2253_v46  ;;  %v3661_v19 = vmul.f32 -1.442695, %v2266_v16 }
 0x2a0   :  { %v2280_v20 = vpop.f32.mrf.mxu0  ;;  %v2293_v21 = vpop.f32.mrf.mxu1  ;;  %3968 = vpow2.f32 %v3660_v18 }
 0x2a1   :  { %3970 = vpow2.f32 %v3661_v19 }
 0x2a3   :  { %v3965_v22 = vpop.eup %3964  ;;  %v2254_v35 = vpop.f32.mrf.mxu2 }
 0x2a4   :  { %v3967_v24 = vpop.eup %3966  ;;  %v2381_v27 = vadd.f32 1.0, %v3965_v22  ;;  %v2267_v36 = vpop.f32.mrf.mxu3 }
 0x2a5   :  { %v4392_v33 = vadd.f32 1.0, %v3967_v24 }
 0x2a6   :  { %3972 = vrcp.f32 %v2381_v27  ;;  %v3969_v39 = vpop.eup %3968  ;;  %v2426_v44 = vand.u32 2147483647, %v2381_v27  ;;  %v2428_v32 = vand.u32 2147483648, %v2381_v27  ;;  %vm2422_vm8 = vweird.f32 %v2381_v27 }
 0x2a7   :  { %3974 = vrcp.f32 %v4392_v33  ;;  %v3971_v40 = vpop.eup %3970  ;;  %v4402_v31 = vadd.f32 1.0, %v3969_v39  ;;  %v2441_v49 = vand.u32 2147483647, %v4392_v33  ;;  %v2443_v50 = vand.u32 2147483648, %v4392_v33 }
 0x2a8   :  { %v4406_v38 = vadd.f32 1.0, %v3971_v40  ;;  %vm4421_vm9 = vcmp.eq.f32.partialorder %v2426_v44, 8.507059e+37  ;;  %v2429_v0 = vor.u32 1.1754944e-38, %v2428_v32  ;;  %vm2437_vm10 = vweird.f32 %v4392_v33 }
 0x2a9   :  { %3976 = vrcp.f32 %v4402_v31  ;;  %vm4426_vm12 = vcmp.eq.f32.partialorder %v2441_v49, 8.507059e+37  ;;  %v2444_v5 = vor.u32 1.1754944e-38, %v2443_v50  ;;  %vm2392_vm13 = vweird.f32 %v4402_v31 }
 0x2aa   :  { %3978 = vrcp.f32 %v4406_v38  ;;  %v2396_v8 = vand.u32 2147483647, %v4402_v31  ;;  %v2398_v10 = vand.u32 2147483648, %v4402_v31  ;;  %vm2407_vm0 = vweird.f32 %v4406_v38 }
 0x2ab   :  { %v2411_v15 = vand.u32 2147483647, %v4406_v38  ;;  %v2413_v16 = vand.u32 2147483648, %v4406_v38 }
 0x2ac   :  { %v3973_v25 = vpop.eup %3972  ;;  %vm2397_vm5 = vcmp.eq.f32.partialorder %v2396_v8, 8.507059e+37 }
 0x2ad   :  { %v3975_v45 = vpop.eup %3974  ;;  %v2418_v48 = vmul.f32 %v3973_v25, %v2381_v27  ;;  %vm2423_vm11 = vweird.f32 %v3973_v25  ;;  %vm4458_vm6 = vcmp.eq.f32.partialorder %v2411_v15, 8.507059e+37  ;;  %v2227_v15 = vadd.f32 %v4373_v60, %v1473_v42 }
 0x2ae   :  { %v2433_v52 = vmul.f32 %v3975_v45, %v4392_v33  ;;  %vm2438_vm14 = vweird.f32 %v3975_v45  ;;  %vm4436_vm15 = vmor %vm2422_vm8, %vm2423_vm11  ;;  %vm2539_vm8 = vcmask 1045508  }
 0x2af   :  { %v2419_v55 = vsub.f32 1.0, %v2418_v48  ;;  %v3977_v56 = vpop.eup %3976  ;;  %vm2439_vm2 = vmor %vm2437_vm10, %vm2438_vm14  ;;  %vm2541_vm10 = vcmask 1043456  }
 0x2b0   :  { %v2434_v1 = vsub.f32 1.0, %v2433_v52  ;;  %v3979_v6 = vpop.eup %3978  ;;  %v2388_v2 = vmul.f32 %v3977_v56, %v4402_v31  ;;  %vm2393_vm1 = vweird.f32 %v3977_v56  ;;  %v2414_v31 = vor.u32 1.1754944e-38, %v2413_v16 }
 0x2b1   :  { %v2420_v3 = vmul.f32 %v3973_v25, %v2419_v55  ;;  %v2403_v12 = vmul.f32 %v3979_v6, %v4406_v38  ;;  %vm2408_vm3 = vweird.f32 %v3979_v6  ;;  %vm4454_vm4 = vmor %vm2392_vm13, %vm2393_vm1  ;;  %v2240_v16 = vadd.f32 %v4375_v61, %v1474_v41 }
 0x2b2   :  { %v2435_v7 = vmul.f32 %v3975_v45, %v2434_v1  ;;  %v2389_v14 = vsub.f32 1.0, %v2388_v2  ;;  %vm2409_vm7 = vmor %vm2407_vm0, %vm2408_vm3 }
 0x2b3   :  { %v2421_v9 = vadd.f32 %v3973_v25, %v2420_v3  ;;  %v2404_v46 = vsub.f32 1.0, %v2403_v12 }
 0x2b4   :  { %v2436_v13 = vadd.f32 %v3975_v45, %v2435_v7  ;;  %v2390_v21 = vmul.f32 %v3977_v56, %v2389_v14 }
 0x2b5   :  { %v2425_v20 = vsel %vm4436_vm15, %v3973_v25, %v2421_v9  ;;  %v2405_v26 = vmul.f32 %v3979_v6, %v2404_v46  ;;  %v2399_v25 = vor.u32 1.1754944e-38, %v2398_v10  ;;  %v1471_v10 = vperm.slane %v4387_v17, 4 }
 0x2b6   :  { %v2330_v18 = vpop.f32.mrf.mxu0  ;;  %v2343_v19 = vpop.f32.mrf.mxu1  ;;  %v2430_v24 = vsel %vm4421_vm9, %v2429_v0, %v2425_v20  ;;  %v2440_v27 = vsel %vm2439_vm2, %v3975_v45, %v2436_v13  ;;  %v2391_v35 = vadd.f32 %v3977_v56, %v2390_v21  ;;  %vm2537_vm9 = vcmask 1041408  }
 0x2b7   :  { %v2331_v22 = vadd.f32 %v2330_v18, %v1481_v53  ;;  %v2344_v23 = vadd.f32 %v2343_v19, %v1482_v54  ;;  %v2509_v30 = vmul.f32 %v2430_v24, %v2349_v43  ;;  %v2445_v28 = vsel %vm4426_vm12, %v2444_v5, %v2440_v27 }
 0x2b8   :  { %v2406_v39 = vadd.f32 %v3979_v6, %v2405_v26  ;;  %v2510_v34 = vmul.f32 %v2445_v28, %v2350_v29  ;;  %v2395_v45 = vsel %vm4454_vm4, %v3977_v56, %v2391_v35  ;;  %v4487_v19 = vadd.f32 %v4377_v62, %v1471_v10 }
 0x2b9   :  { %v3666_v36 = vmul.f32 -1.442695, %v2331_v22  ;;  %v3667_v37 = vmul.f32 -1.442695, %v2344_v23  ;;  %v2517_v40 = vmax.f32 %v2509_v30, 0.0  ;;  %v2400_v49 = vsel %vm2397_vm5, %v2399_v25, %v2395_v45 }
 0x2ba   :  { %v2410_v50 = vsel %vm2409_vm7, %v3979_v6, %v2406_v39  ;;  %v2518_v52 = vmax.f32 %v2510_v34, 0.0  ;;  %v1472_v20 = vperm.slane %v4387_v17, 5  ;;  %v2353_v24 = vmax.f32 %v2227_v15, 0.0 }
 0x2bb   :  { %3980 = vpow2.f32 %v3666_v36  ;;  %v2304_v44 = vpop.f32.mrf.mxu2  ;;  %v2317_v32 = vpop.f32.mrf.mxu3  ;;  %v2532_v53 = vrot.slane %v2517_v40, 4  ;;  %v2415_v1 = vsel %vm4458_vm6, %v2414_v31, %v2410_v50  ;;  %v2354_v27 = vmax.f32 %v2240_v16, 0.0 }
 0x2bc   :  { %3982 = vpow2.f32 %v3667_v37  ;;  %v2305_v48 = vadd.f32 %v2304_v44, %v1479_v57  ;;  %v2318_v29 = vadd.f32 %v2317_v32, %v1480_v58  ;;  %v2508_v38 = vmul.f32 %v2415_v1, %v2348_v51 }
 0x2bd   :  { %v2533_v56 = vrot.slane %v2518_v52, 2  ;;  %v2507_v57 = vmul.f32 %v2400_v49, %v2347_v47  ;;  %v2351_v36 = vmax.f32 %v4487_v19, 0.0  ;;  %v2214_v37 = vadd.f32 %v4379_v63, %v1472_v20 }
 0x2be   :  { %v3664_v54 = vmul.f32 -1.442695, %v2305_v48  ;;  %v3665_v55 = vmul.f32 -1.442695, %v2318_v29  ;;  %v2332_v59 = vpop.f32.mrf.mxu0  ;;  %v2345_v0 = vpop.f32.mrf.mxu1  ;;  %v2516_v3 = vmax.f32 %v2508_v38, 0.0 }
 0x2bf   :  { %v2540_v4 = vsel %vm2539_vm8, %v2532_v53, %v2533_v56  ;;  %v2515_v51 = vmax.f32 %v2507_v57, 0.0  ;;  %v2352_v56 = vmax.f32 %v2214_v37, 0.0 }
 0x2c0   :  { %3984 = vpow2.f32 %v3664_v54  ;;  %v2531_v9 = vrot.slane %v2516_v3, 6 }
 0x2c1   :  { %v3981_v58 = vpop.eup %3980  ;;  %3986 = vpow2.f32 %v3665_v55 }
 0x2c2   :  { %v3983_v5 = vpop.eup %3982  ;;  %v2385_v6 = vadd.f32 1.0, %v3981_v58  ;;  %v2538_v12 = vsel %vm2537_vm9, %v2515_v51, %v2531_v9 }
 0x2c3   :  { %v2386_v7 = vadd.f32 1.0, %v3983_v5  ;;  %v2306_v2 = vpop.f32.mrf.mxu2  ;;  %v2319_v8 = vpop.f32.mrf.mxu3  ;;  %v2542_v14 = vsel %vm2541_vm10, %v2538_v12, %v2540_v4 }
 0x2c4   :  { %3988 = vrcp.f32 %v2385_v6  ;;  %2548 = vst [vmem:[#allocation14] sm:$0xff] %v2542_v14  ;;  %v2486_v23 = vand.u32 2147483647, %v2385_v6  ;;  %v2488_v60 = vand.u32 2147483648, %v2385_v6  ;;  %vm2482_vm11 = vweird.f32 %v2385_v6 }
 0x2c5   :  { %3990 = vrcp.f32 %v2386_v7  ;;  %v2501_v35 = vand.u32 2147483647, %v2386_v7  ;;  %v2503_v61 = vand.u32 2147483648, %v2386_v7  ;;  %vm2497_vm14 = vweird.f32 %v2386_v7 }
 0x2c6   :  { %v3985_v47 = vpop.eup %3984  ;;  %vm4493_vm13 = vcmp.eq.f32.partialorder %v2486_v23, 8.507059e+37  ;;  %v2489_v34 = vor.u32 1.1754944e-38, %v2488_v60 }
 0x2c7   :  { %v3987_v11 = vpop.eup %3986  ;;  %v4478_v13 = vadd.f32 1.0, %v3985_v47  ;;  %vm4498_vm0 = vcmp.eq.f32.partialorder %v2501_v35, 8.507059e+37  ;;  %v2504_v63 = vor.u32 1.1754944e-38, %v2503_v61 }
 0x2c8   :  { %v4482_v46 = vadd.f32 1.0, %v3987_v11 }
 0x2c9   :  { %3992 = vrcp.f32 %v4478_v13  ;;  %v2456_v48 = vand.u32 2147483647, %v4478_v13  ;;  %v2458_v29 = vand.u32 2147483648, %v4478_v13  ;;  %vm2452_vm5 = vweird.f32 %v4478_v13 }
 0x2ca   :  { %v3989_v18 = vpop.eup %3988  ;;  %3994 = vrcp.f32 %v4482_v46  ;;  %v2471_v50 = vand.u32 2147483647, %v4482_v46  ;;  %v2473_v52 = vand.u32 2147483648, %v4482_v46  ;;  %vm2467_vm7 = vweird.f32 %v4482_v46 }
 0x2cb   :  { %v3991_v21 = vpop.eup %3990  ;;  %v2478_v22 = vmul.f32 %v3989_v18, %v2385_v6  ;;  %vm2483_vm12 = vweird.f32 %v3989_v18  ;;  %v2459_v3 = vor.u32 1.1754944e-38, %v2458_v29 }
 0x2cc   :  { %v2493_v26 = vmul.f32 %v3991_v21, %v2386_v7  ;;  %vm2498_vm15 = vweird.f32 %v3991_v21  ;;  %vm2484_vm1 = vmor %vm2482_vm11, %vm2483_vm12  ;;  %vm2457_vm11 = vcmp.eq.f32.partialorder %v2456_v48, 8.507059e+37  ;;  %v2474_v6 = vor.u32 1.1754944e-38, %v2473_v52 }
 0x2cd   :  { %v2479_v30 = vsub.f32 1.0, %v2478_v22  ;;  %vm2499_vm2 = vmor %vm2497_vm14, %vm2498_vm15 }
 0x2ce   :  { %v2494_v62 = vsub.f32 1.0, %v2493_v26 }
 0x2cf   :  { %v3993_v28 = vpop.eup %3992  ;;  %v2480_v17 = vmul.f32 %v3989_v18, %v2479_v30 }
 0x2d0   :  { %v3995_v39 = vpop.eup %3994  ;;  %v2495_v40 = vmul.f32 %v3991_v21, %v2494_v62  ;;  %v2448_v25 = vmul.f32 %v3993_v28, %v4478_v13  ;;  %vm2453_vm3 = vweird.f32 %v3993_v28 }
 0x2d1   :  { %v2481_v43 = vadd.f32 %v3989_v18, %v2480_v17  ;;  %v2463_v32 = vmul.f32 %v3995_v39, %v4482_v46  ;;  %vm2468_vm4 = vweird.f32 %v3995_v39  ;;  %vm2454_vm6 = vmor %vm2452_vm5, %vm2453_vm3 }
 0x2d2   :  { %v2496_v45 = vadd.f32 %v3991_v21, %v2495_v40  ;;  %v2449_v31 = vsub.f32 1.0, %v2448_v25  ;;  %vm2469_vm12 = vmor %vm2467_vm7, %vm2468_vm4 }
 0x2d3   :  { %v2464_v49 = vsub.f32 1.0, %v2463_v32  ;;  %v2485_v53 = vsel %vm2484_vm1, %v3989_v18, %v2481_v43 }
 0x2d4   :  { %v2450_v54 = vmul.f32 %v3993_v28, %v2449_v31  ;;  %v2490_v55 = vsel %vm4493_vm13, %v2489_v34, %v2485_v53  ;;  %v2500_v59 = vsel %vm2499_vm2, %v3991_v21, %v2496_v45  ;;  %vm2472_vm13 = vcmp.eq.f32.partialorder %v2471_v50, 8.507059e+37 }
 0x2d5   :  { %v2465_v0 = vmul.f32 %v3995_v39, %v2464_v49  ;;  %v2505_v1 = vsel %vm4498_vm0, %v2504_v63, %v2500_v59  ;;  %v2513_v38 = vmul.f32 %v2490_v55, %v2353_v24 }
 0x2d6   :  { %v2451_v57 = vadd.f32 %v3993_v28, %v2450_v54  ;;  %v2514_v58 = vmul.f32 %v2505_v1, %v2354_v27 }
 0x2d7   :  { %v2466_v4 = vadd.f32 %v3995_v39, %v2465_v0  ;;  %v2521_v5 = vmax.f32 %v2513_v38, 0.0 }
 0x2d8   :  { %v2455_v7 = vsel %vm2454_vm6, %v3993_v28, %v2451_v57  ;;  %v2522_v2 = vmax.f32 %v2514_v58, 0.0 }
 0x2d9   :  { %v2460_v8 = vsel %vm2457_vm11, %v2459_v3, %v2455_v7  ;;  %v2470_v9 = vsel %vm2469_vm12, %v3995_v39, %v2466_v4  ;;  %v2535_v42 = vrot.slane %v2521_v5, 4 }
 0x2da   :  { %v2475_v51 = vsel %vm2472_vm13, %v2474_v6, %v2470_v9  ;;  %v2536_v41 = vrot.slane %v2522_v2, 2  ;;  %v2511_v47 = vmul.f32 %v2460_v8, %v2351_v36 }
 0x2db   :  { %v2512_v10 = vmul.f32 %v2475_v51, %v2352_v56 }
 0x2dc   :  { %v2544_v12 = vsel %vm2539_vm8, %v2535_v42, %v2536_v41  ;;  %v2519_v13 = vmax.f32 %v2511_v47, 0.0 }
 0x2dd   :  { %v2520_v11 = vmax.f32 %v2512_v10, 0.0 }
 0x2df   :  { %v2534_v14 = vrot.slane %v2520_v11, 6 }
 0x2e1   :  { %v2543_v15 = vsel %vm2537_vm9, %v2519_v13, %v2534_v14 }
 0x2e2   :  { %v2545_v46 = vsel %vm2541_vm10, %v2543_v15, %v2544_v12 }
 0x2e3   :  { %2549 = vst [vmem:[#allocation14 + $0x8] sm:$0xff] %v2545_v46 }
 0x2e4   :  { %2560 = dma.vmem_to_hbm [thread:$0]  %s2556_s8, 256, %s2558_s17, [#allocation4]  }
 0x2e5   :  { %4196 = dma.done.wait [#allocation4], 256  }
 0x2e6   :  { %4197 = vsyncadd [#allocation4], 4294967040 }
 0x2e7   :  { %2565 = vsyncpa [#allocation3], 1 }
 0x2e8   :  { %2566 = vsyncpa [#allocation6], 1 }
 0x2e9   :  { %2567 = vsyncpa [#allocation9], 1 }
 0x2ea   :  { %2568 = vsyncpa [#allocation12], 1 }
 0x2eb   :  { %2569 = vsyncpa [#allocation4], 1 }

</bundles_post_ra>
